<compile_context>
chip_gen: v7x
topology: tpu7x:2x2x1
jax: 0.10.0
libtpu: 0.0.40
codegen_flags: <defaults>
</compile_context>

<pallas_src>
import functools

import jax
import jax.numpy as jnp
import numpy as np
from jax.experimental import pallas as pl
from jax.experimental.pallas import tpu as pltpu


# ----------------------------------------------------------------------------
# helpers
# ----------------------------------------------------------------------------
def _layer_norm(x, gamma, beta, eps=1e-5):
    # PyTorch nn.LayerNorm: biased variance, eps=1e-5
    mean = jnp.mean(x, axis=-1, keepdims=True)
    var = jnp.mean((x - mean) ** 2, axis=-1, keepdims=True)
    return (x - mean) * jax.lax.rsqrt(var + eps) * gamma + beta


# ----------------------------------------------------------------------------
# Fused Encoder kernel: embedding (at layer 0) + one EncoderLayer per grid step
#   grid = (batch, layer);  the running activation x lives in VMEM scratch.
# ----------------------------------------------------------------------------
def _encoder_kernel(
    src_ref, wemb_ref, bemb_ref,
    wq_ref, bq_ref, wk_ref, bk_ref, wv_ref, bv_ref,
    wo_ref, bo_ref, g1_ref, be1_ref,
    w1_ref, b1_ref, w2_ref, b2_ref, g2_ref, be2_ref,
    o_ref, x_scr,
    *, n_heads, head_dim,
):
    layer = pl.program_id(1)
    n_layers = pl.num_programs(1)
    bf16 = jnp.bfloat16

    # ---- fused token + positional embedding, once per batch block ----------
    @pl.when(layer == 0)
    def _():
        emb = jnp.dot(src_ref[0].astype(bf16), wemb_ref[...],
                      preferred_element_type=jnp.float32) + bemb_ref[...]
        # TODO(synk): dropout after the embedding is identity in eval mode.
        x_scr[...] = emb

    x = x_scr[...]                       # (S, H) fp32, resident across layers
    S, H = x.shape
    xb = x.astype(bf16)

    # ---- multi-head self-attention (heads batched, bf16 MXU, fp32 accum) ---
    xh = jnp.broadcast_to(xb[None], (n_heads, S, H))        # (nH, S, H)

    q = jnp.einsum("hsk,hkd->hsd", xh, wq_ref[0],
                   preferred_element_type=jnp.float32) + bq_ref[0]
    k = jnp.einsum("hsk,hkd->hsd", xh, wk_ref[0],
                   preferred_element_type=jnp.float32) + bk_ref[0]
    v = jnp.einsum("hsk,hkd->hsd", xh, wv_ref[0],
                   preferred_element_type=jnp.float32) + bv_ref[0]

    inv_scale = 1.0 / float(np.sqrt(head_dim))
    qb = (q * inv_scale).astype(bf16)                        # fold 1/sqrt(hd) into q
    kb = k.astype(bf16)
    vb = v.astype(bf16)

    energy = jnp.einsum("hqd,hkd->hqk", qb, kb,
                        preferred_element_type=jnp.float32)  # (nH, S, S)
    m = jnp.max(energy, axis=-1, keepdims=True)
    e = jnp.exp(energy - m)
    attn = e * pl.reciprocal(jnp.sum(e, axis=-1, keepdims=True), approx=True)
    # TODO(synk): dropout on the attention map is identity in eval mode.

    ctx = jnp.einsum("hqk,hkd->hqd", attn.astype(bf16), vb,
                     preferred_element_type=jnp.float32)     # (nH, S, hd)

    # output projection fused with the head-concat: sum_h ctx[h] @ Wo[h]
    per_head = jnp.einsum("hsd,hdk->hsk", ctx.astype(bf16), wo_ref[0],
                          preferred_element_type=jnp.float32)
    attn_out = jnp.sum(per_head, axis=0) + bo_ref[0]         # (S, H)

    # residual + LayerNorm 1 (fp32)
    src1 = _layer_norm(x + attn_out, g1_ref[0], be1_ref[0])

    # ---- position-wise feed-forward ----------------------------------------
    h1 = jnp.dot(src1.astype(bf16), w1_ref[0],
                 preferred_element_type=jnp.float32) + b1_ref[0]
    h1 = jnp.maximum(h1, 0.0)                                # relu
    ff = jnp.dot(h1.astype(bf16), w2_ref[0],
                 preferred_element_type=jnp.float32) + b2_ref[0]

    # residual + LayerNorm 2 (fp32)
    out = _layer_norm(src1 + ff, g2_ref[0], be2_ref[0])
    x_scr[...] = out                                         # carry to next layer

    @pl.when(layer == n_layers - 1)
    def _():
        o_ref[0] = out


# ----------------------------------------------------------------------------
# wrapper: trace-time weight fusion / head-major layout + one pallas_call
# ----------------------------------------------------------------------------
def encoder_forward(src, params, hidden_dim, n_heads):
    B, S, Din = src.shape
    H = hidden_dim
    hd = H // n_heads
    L = params["wq"].shape[0]
    bf16 = jnp.bfloat16

    # --- fuse token & positional projections (trace time, exact in fp32) ----
    scale = float(np.sqrt(H))
    pos_w_pad = jnp.concatenate(
        [jnp.zeros((1, H), jnp.float32), params["pos_w"]], axis=0)   # (Din, H)
    w_emb = (params["tok_w"] * scale + pos_w_pad).astype(bf16)       # (Din, H)
    b_emb = params["tok_b"] * scale + params["pos_b"]                # (1, H) fp32

    # --- head-major weight layouts (trace-time reshapes, free) --------------
    def head_major(w):   # (L, H, H) -> (L, nH, H, hd)
        return w.reshape(L, H, n_heads, hd).transpose(0, 2, 1, 3).astype(bf16)

    def head_bias(b):    # (L, 1, H) -> (L, nH, 1, hd)
        return b.reshape(L, n_heads, hd)[:, :, None, :]

    wq, wk, wv = (head_major(params[n]) for n in ("wq", "wk", "wv"))
    bq, bk, bv = (head_bias(params[n]) for n in ("bq", "bk", "bv"))
    wo = params["wo"].reshape(L, n_heads, hd, H).astype(bf16)        # (L,nH,hd,H)
    bo = params["bo"]                                                # (L,1,H)
    w1 = params["w1"].astype(bf16)
    b1 = params["b1"]
    w2 = params["w2"].astype(bf16)
    b2 = params["b2"]
    g1, be1, g2, be2 = params["g1"], params["be1"], params["g2"], params["be2"]

    # per-layer streamed blocks (double-buffered across the layer axis)
    def lspec(shape):
        nd = len(shape)
        return pl.BlockSpec((1,) + tuple(shape[1:]),
                            lambda b, l, nd=nd: (l,) + (0,) * (nd - 1))

    # grid-invariant blocks (fetched once)
    def cspec(shape):
        nd = len(shape)
        return pl.BlockSpec(tuple(shape), lambda b, l, nd=nd: (0,) * nd)

    layer_ops = (wq, bq, wk, bk, wv, bv, wo, bo, g1, be1, w1, b1, w2, b2, g2, be2)
    operands = (src, w_emb, b_emb) + layer_ops

    in_specs = [pl.BlockSpec((1, S, Din), lambda b, l: (b, 0, 0)),
                cspec(w_emb.shape), cspec(b_emb.shape)]
    in_specs += [lspec(a.shape) for a in layer_ops]

    return pl.pallas_call(
        functools.partial(_encoder_kernel, n_heads=n_heads, head_dim=hd),
        out_shape=jax.ShapeDtypeStruct((B, S, H), jnp.float32),
        grid=(B, L),
        in_specs=in_specs,
        out_specs=pl.BlockSpec((1, S, H), lambda b, l: (b, 0, 0)),
        scratch_shapes=[pltpu.VMEM((S, H), jnp.float32)],   # resident activation
        compiler_params=pltpu.CompilerParams(
            dimension_semantics=("parallel", "arbitrary"),
            # leave headroom for v7x's 64 MiB physical VMEM; this kernel's
            # working set (bf16 weights + tiny activations) is only a few MiB.
            vmem_limit_bytes=48 * 1024 * 1024,
        ),
    )(*operands)
    # TODO(synk): for large S, switch to flash-style key tiling instead of the
    # full [S, S] per-head energies (unnecessary at these sequence lengths).


# ----------------------------------------------------------------------------
# deterministic parameter init (synthetic; weights stored as [in, out],
# per-layer tensors stacked along a leading L axis)
# ----------------------------------------------------------------------------
def init_params(key, input_dim, hidden_dim, n_layers, n_heads, pf_dim):
    def lin(k, din, dout):
        k1, k2 = jax.random.split(k)
        w = jax.random.normal(k1, (din, dout), jnp.float32) * 0.05
        b = jax.random.normal(k2, (1, dout), jnp.float32) * 0.05
        return w, b

    keys = jax.random.split(key, 2 + n_layers)
    tok_w, tok_b = lin(keys[0], input_dim, hidden_dim)
    pos_w, pos_b = lin(keys[1], input_dim - 1, hidden_dim)

    per_layer = []
    for i in range(n_layers):
        lk = jax.random.split(keys[2 + i], 6)
        wq, bq = lin(lk[0], hidden_dim, hidden_dim)
        wk, bk = lin(lk[1], hidden_dim, hidden_dim)
        wv, bv = lin(lk[2], hidden_dim, hidden_dim)
        wo, bo = lin(lk[3], hidden_dim, hidden_dim)
        w1, b1 = lin(lk[4], hidden_dim, pf_dim)
        w2, b2 = lin(lk[5], pf_dim, hidden_dim)
        per_layer.append(dict(
            wq=wq, bq=bq, wk=wk, bk=bk, wv=wv, bv=bv, wo=wo, bo=bo,
            g1=jnp.ones((1, hidden_dim), jnp.float32),
            be1=jnp.zeros((1, hidden_dim), jnp.float32),
            w1=w1, b1=b1, w2=w2, b2=b2,
            g2=jnp.ones((1, hidden_dim), jnp.float32),
            be2=jnp.zeros((1, hidden_dim), jnp.float32),
        ))
    stacked = {k: jnp.stack([lyr[k] for lyr in per_layer], axis=0)
               for k in per_layer[0]}
    return dict(tok_w=tok_w, tok_b=tok_b, pos_w=pos_w, pos_b=pos_b, **stacked)


# ----------------------------------------------------------------------------
# pure-JAX fp32 reference (mirrors the PyTorch forward in eval mode)
# ----------------------------------------------------------------------------
def encoder_ref(src, params, hidden_dim, n_heads):
    B, S, _ = src.shape
    hd = hidden_dim // n_heads
    scale = jnp.sqrt(jnp.float32(hidden_dim))
    ascale = jnp.sqrt(jnp.float32(hd))
    pos = src[:, :, 1:]
    x = (src @ params["tok_w"] + params["tok_b"]) * scale \
        + (pos @ params["pos_w"] + params["pos_b"])
    L = params["wq"].shape[0]
    for i in range(L):
        Q = (x @ params["wq"][i] + params["bq"][i]).reshape(B, S, n_heads, hd).transpose(0, 2, 1, 3)
        K = (x @ params["wk"][i] + params["bk"][i]).reshape(B, S, n_heads, hd).transpose(0, 2, 1, 3)
        V = (x @ params["wv"][i] + params["bv"][i]).reshape(B, S, n_heads, hd).transpose(0, 2, 1, 3)
        energy = jnp.einsum("bhqd,bhkd->bhqk", Q, K) / ascale
        attn = jax.nn.softmax(energy, axis=-1)
        o = jnp.einsum("bhqk,bhkd->bhqd", attn, V).transpose(0, 2, 1, 3)
        o = o.reshape(B, S, hidden_dim) @ params["wo"][i] + params["bo"][i]
        x = _layer_norm(x + o, params["g1"][i], params["be1"][i])
        ff = jnp.maximum(x @ params["w1"][i] + params["b1"][i], 0.0) \
            @ params["w2"][i] + params["b2"][i]
        x = _layer_norm(x + ff, params["g2"][i], params["be2"][i])
    return x


# ----------------------------------------------------------------------------
if __name__ == "__main__":
    # small config consistent with the module; hidden/pf/head dims are
    # multiples of 128 so all blocks are lane-dense.
    B, S = 2, 8
    input_dim = 8
    hidden_dim = 256
    n_layers = 2
    n_heads = 2          # head_dim = 128
    pf_dim = 512

    key = jax.random.PRNGKey(0)
    k_src, k_par = jax.random.split(key)
    src = jax.random.normal(k_src, (B, S, input_dim), jnp.float32)
    params = init_params(k_par, input_dim, hidden_dim, n_layers, n_heads, pf_dim)

    out = jax.block_until_ready(encoder_forward(src, params, hidden_dim, n_heads))
    ref = jax.block_until_ready(encoder_ref(src, params, hidden_dim, n_heads))

    assert out.shape == (B, S, hidden_dim)
    # bf16 MXU operands + approx reciprocal vs. a pure-fp32 reference -> a
    # slightly loosened tolerance (outputs are O(1) after LayerNorm).
    np.testing.assert_allclose(np.asarray(out), np.asarray(ref),
                               rtol=5e-2, atol=5e-2)

    print("KERNEL_OK")
</pallas_src>

<mosaic_0001>
module attributes {stable_mosaic.version = 11 : i64} {
  func.func @_encoder_kernel(%arg0: i32, %arg1: i32, %arg2: memref<1x8x8xf32, #tpu.memory_space<vmem>>, %arg3: memref<8x256xbf16, #tpu.memory_space<vmem>>, %arg4: memref<1x256xf32, #tpu.memory_space<vmem>>, %arg5: memref<1x2x256x128xbf16, #tpu.memory_space<vmem>>, %arg6: memref<1x2x1x128xf32, #tpu.memory_space<vmem>>, %arg7: memref<1x2x256x128xbf16, #tpu.memory_space<vmem>>, %arg8: memref<1x2x1x128xf32, #tpu.memory_space<vmem>>, %arg9: memref<1x2x256x128xbf16, #tpu.memory_space<vmem>>, %arg10: memref<1x2x1x128xf32, #tpu.memory_space<vmem>>, %arg11: memref<1x2x128x256xbf16, #tpu.memory_space<vmem>>, %arg12: memref<1x1x256xf32, #tpu.memory_space<vmem>>, %arg13: memref<1x1x256xf32, #tpu.memory_space<vmem>>, %arg14: memref<1x1x256xf32, #tpu.memory_space<vmem>>, %arg15: memref<1x256x512xbf16, #tpu.memory_space<vmem>>, %arg16: memref<1x1x512xf32, #tpu.memory_space<vmem>>, %arg17: memref<1x512x256xbf16, #tpu.memory_space<vmem>>, %arg18: memref<1x1x256xf32, #tpu.memory_space<vmem>>, %arg19: memref<1x1x256xf32, #tpu.memory_space<vmem>>, %arg20: memref<1x1x256xf32, #tpu.memory_space<vmem>>, %arg21: memref<1x8x256xf32, #tpu.memory_space<vmem>>, %arg22: memref<8x256xf32, #tpu.memory_space<vmem>>) attributes {dimension_semantics = [#tpu.dimension_semantics<parallel>, #tpu.dimension_semantics<arbitrary>], iteration_bounds = array<i64: 2, 2>, scalar_prefetch = 0 : i64, scratch_operands = 1 : i64, tpu.core_type = #tpu.core_type<tc>, window_params = [{transform_indices = @transform_0, window_bounds = array<i64: 1, 8, 8>}, {pipeline_mode = #tpu.pipeline_mode<synchronous>, transform_indices = @transform_1, window_bounds = array<i64: 8, 256>}, {pipeline_mode = #tpu.pipeline_mode<synchronous>, transform_indices = @transform_2, window_bounds = array<i64: 1, 256>}, {transform_indices = @transform_3, window_bounds = array<i64: 1, 2, 256, 128>}, {transform_indices = @transform_4, window_bounds = array<i64: 1, 2, 1, 128>}, {transform_indices = @transform_5, window_bounds = array<i64: 1, 2, 256, 128>}, {transform_indices = @transform_6, window_bounds = array<i64: 1, 2, 1, 128>}, {transform_indices = @transform_7, window_bounds = array<i64: 1, 2, 256, 128>}, {transform_indices = @transform_8, window_bounds = array<i64: 1, 2, 1, 128>}, {transform_indices = @transform_9, window_bounds = array<i64: 1, 2, 128, 256>}, {transform_indices = @transform_10, window_bounds = array<i64: 1, 1, 256>}, {transform_indices = @transform_11, window_bounds = array<i64: 1, 1, 256>}, {transform_indices = @transform_12, window_bounds = array<i64: 1, 1, 256>}, {transform_indices = @transform_13, window_bounds = array<i64: 1, 256, 512>}, {transform_indices = @transform_14, window_bounds = array<i64: 1, 1, 512>}, {transform_indices = @transform_15, window_bounds = array<i64: 1, 512, 256>}, {transform_indices = @transform_16, window_bounds = array<i64: 1, 1, 256>}, {transform_indices = @transform_17, window_bounds = array<i64: 1, 1, 256>}, {transform_indices = @transform_18, window_bounds = array<i64: 1, 1, 256>}, {transform_indices = @transform_19, window_bounds = array<i64: 1, 8, 256>}]} {
    %c0_i32 = arith.constant 0 : i32
    %0 = arith.cmpi eq, %arg1, %c0_i32 : i32
    %1 = arith.extui %0 : i1 to i32
    %c0_i32_0 = arith.constant 0 : i32
    %2 = arith.cmpi ne, %1, %c0_i32_0 : i32
    scf.if %2 {
      %c0_82 = arith.constant 0 : index
      %c0_83 = arith.constant 0 : index
      %c0_84 = arith.constant 0 : index
      %132 = vector.load %arg2[%c0_82, %c0_83, %c0_84] : memref<1x8x8xf32, #tpu.memory_space<vmem>>, vector<1x8x8xf32>
      %133 = vector.shape_cast %132 : vector<1x8x8xf32> to vector<8x8xf32>
      %134 = arith.truncf %133 : vector<8x8xf32> to vector<8x8xbf16>
      %c0_85 = arith.constant 0 : index
      %c0_86 = arith.constant 0 : index
      %135 = vector.load %arg3[%c0_85, %c0_86] : memref<8x256xbf16, #tpu.memory_space<vmem>>, vector<8x256xbf16>
      %cst_87 = arith.constant dense<0.000000e+00> : vector<8x256xf32>
      %136 = tpu.matmul %134, %135, %cst_87 {dimension_numbers = #tpu.dot_dimension_numbers<[1], [0], [0], [1], [0, 0, 1, 1], [], []>} : vector<8x8xbf16>, vector<8x256xbf16>, vector<8x256xf32> -> vector<8x256xf32>
      %c0_88 = arith.constant 0 : index
      %c0_89 = arith.constant 0 : index
      %137 = vector.load %arg4[%c0_88, %c0_89] : memref<1x256xf32, #tpu.memory_space<vmem>>, vector<1x256xf32>
      %138 = vector.broadcast %137 : vector<1x256xf32> to vector<8x256xf32>
      %139 = arith.addf %136, %138 : vector<8x256xf32>
      %c0_90 = arith.constant 0 : index
      %c0_91 = arith.constant 0 : index
      %140 = vector.load %arg22[%c0_90, %c0_91] : memref<8x256xf32, #tpu.memory_space<vmem>>, vector<8x256xf32>
      tpu.vector_store %arg22[%c0_90, %c0_91], %139 {strides = array<i32>} : memref<8x256xf32, #tpu.memory_space<vmem>>, vector<8x256xf32>,
    } else {
    }
    %c0 = arith.constant 0 : index
    %c0_1 = arith.constant 0 : index
    %3 = vector.load %arg22[%c0, %c0_1] : memref<8x256xf32, #tpu.memory_space<vmem>>, vector<8x256xf32>
    %4 = arith.truncf %3 : vector<8x256xf32> to vector<8x256xbf16>
    %5 = vector.shape_cast %4 : vector<8x256xbf16> to vector<1x8x256xbf16>
    %6 = vector.shape_cast %5 : vector<1x8x256xbf16> to vector<1x8x256xbf16>
    %7 = vector.broadcast %6 : vector<1x8x256xbf16> to vector<2x8x256xbf16>
    %c0_2 = arith.constant 0 : index
    %c0_3 = arith.constant 0 : index
    %c0_4 = arith.constant 0 : index
    %c0_5 = arith.constant 0 : index
    %8 = vector.load %arg5[%c0_2, %c0_3, %c0_4, %c0_5] : memref<1x2x256x128xbf16, #tpu.memory_space<vmem>>, vector<1x2x256x128xbf16>
    %9 = vector.shape_cast %8 : vector<1x2x256x128xbf16> to vector<2x256x128xbf16>
    "tpu.trace_start"() <{level = 10 : i32, message = "hsk,hkd->hsd"}> : () -> ()
    %cst = arith.constant dense<0.000000e+00> : vector<2x8x128xf32>
    %10 = tpu.matmul %7, %9, %cst {dimension_numbers = #tpu.dot_dimension_numbers<[2], [1], [1], [2], [0, 0, 0, 1, 1, 2], [0], [0]>} : vector<2x8x256xbf16>, vector<2x256x128xbf16>, vector<2x8x128xf32> -> vector<2x8x128xf32>
    "tpu.trace_stop"() : () -> ()
    %c0_6 = arith.constant 0 : index
    %c0_7 = arith.constant 0 : index
    %c0_8 = arith.constant 0 : index
    %c0_9 = arith.constant 0 : index
    %11 = vector.load %arg6[%c0_6, %c0_7, %c0_8, %c0_9] : memref<1x2x1x128xf32, #tpu.memory_space<vmem>>, vector<1x2x1x128xf32>
    %12 = vector.shape_cast %11 : vector<1x2x1x128xf32> to vector<2x1x128xf32>
    %13 = vector.broadcast %12 : vector<2x1x128xf32> to vector<2x8x128xf32>
    %14 = arith.addf %10, %13 : vector<2x8x128xf32>
    %c0_10 = arith.constant 0 : index
    %c0_11 = arith.constant 0 : index
    %c0_12 = arith.constant 0 : index
    %c0_13 = arith.constant 0 : index
    %15 = vector.load %arg7[%c0_10, %c0_11, %c0_12, %c0_13] : memref<1x2x256x128xbf16, #tpu.memory_space<vmem>>, vector<1x2x256x128xbf16>
    %16 = vector.shape_cast %15 : vector<1x2x256x128xbf16> to vector<2x256x128xbf16>
    "tpu.trace_start"() <{level = 10 : i32, message = "hsk,hkd->hsd"}> : () -> ()
    %cst_14 = arith.constant dense<0.000000e+00> : vector<2x8x128xf32>
    %17 = tpu.matmul %7, %16, %cst_14 {dimension_numbers = #tpu.dot_dimension_numbers<[2], [1], [1], [2], [0, 0, 0, 1, 1, 2], [0], [0]>} : vector<2x8x256xbf16>, vector<2x256x128xbf16>, vector<2x8x128xf32> -> vector<2x8x128xf32>
    "tpu.trace_stop"() : () -> ()
    %c0_15 = arith.constant 0 : index
    %c0_16 = arith.constant 0 : index
    %c0_17 = arith.constant 0 : index
    %c0_18 = arith.constant 0 : index
    %18 = vector.load %arg8[%c0_15, %c0_16, %c0_17, %c0_18] : memref<1x2x1x128xf32, #tpu.memory_space<vmem>>, vector<1x2x1x128xf32>
    %19 = vector.shape_cast %18 : vector<1x2x1x128xf32> to vector<2x1x128xf32>
    %20 = vector.broadcast %19 : vector<2x1x128xf32> to vector<2x8x128xf32>
    %21 = arith.addf %17, %20 : vector<2x8x128xf32>
    %c0_19 = arith.constant 0 : index
    %c0_20 = arith.constant 0 : index
    %c0_21 = arith.constant 0 : index
    %c0_22 = arith.constant 0 : index
    %22 = vector.load %arg9[%c0_19, %c0_20, %c0_21, %c0_22] : memref<1x2x256x128xbf16, #tpu.memory_space<vmem>>, vector<1x2x256x128xbf16>
    %23 = vector.shape_cast %22 : vector<1x2x256x128xbf16> to vector<2x256x128xbf16>
    "tpu.trace_start"() <{level = 10 : i32, message = "hsk,hkd->hsd"}> : () -> ()
    %cst_23 = arith.constant dense<0.000000e+00> : vector<2x8x128xf32>
    %24 = tpu.matmul %7, %23, %cst_23 {dimension_numbers = #tpu.dot_dimension_numbers<[2], [1], [1], [2], [0, 0, 0, 1, 1, 2], [0], [0]>} : vector<2x8x256xbf16>, vector<2x256x128xbf16>, vector<2x8x128xf32> -> vector<2x8x128xf32>
    "tpu.trace_stop"() : () -> ()
    %c0_24 = arith.constant 0 : index
    %c0_25 = arith.constant 0 : index
    %c0_26 = arith.constant 0 : index
    %c0_27 = arith.constant 0 : index
    %25 = vector.load %arg10[%c0_24, %c0_25, %c0_26, %c0_27] : memref<1x2x1x128xf32, #tpu.memory_space<vmem>>, vector<1x2x1x128xf32>
    %26 = vector.shape_cast %25 : vector<1x2x1x128xf32> to vector<2x1x128xf32>
    %27 = vector.broadcast %26 : vector<2x1x128xf32> to vector<2x8x128xf32>
    %28 = arith.addf %24, %27 : vector<2x8x128xf32>
    %cst_28 = arith.constant 0.0883883461 : f32
    %29 = vector.broadcast %cst_28 : f32 to vector<2x8x128xf32>
    %30 = arith.mulf %14, %29 : vector<2x8x128xf32>
    %31 = arith.truncf %30 : vector<2x8x128xf32> to vector<2x8x128xbf16>
    %32 = arith.truncf %21 : vector<2x8x128xf32> to vector<2x8x128xbf16>
    %33 = arith.truncf %28 : vector<2x8x128xf32> to vector<2x8x128xbf16>
    "tpu.trace_start"() <{level = 10 : i32, message = "hqd,hkd->hqk"}> : () -> ()
    %cst_29 = arith.constant dense<0.000000e+00> : vector<2x8x8xf32>
    %34 = tpu.matmul %31, %32, %cst_29 {dimension_numbers = #tpu.dot_dimension_numbers<[2], [2], [1], [1], [0, 0, 0, 1, 1, 1], [0], [0]>} : vector<2x8x128xbf16>, vector<2x8x128xbf16>, vector<2x8x8xf32> -> vector<2x8x8xf32>
    "tpu.trace_stop"() : () -> ()
    %cst_30 = arith.constant dense<0xFF800000> : vector<2x8xf32>
    %35 = vector.multi_reduction <maximumf>, %34, %cst_30 [2] : vector<2x8x8xf32> to vector<2x8xf32>
    %36 = vector.shape_cast %35 : vector<2x8xf32> to vector<2x8x1xf32>
    %37 = vector.broadcast %36 : vector<2x8x1xf32> to vector<2x8x8xf32>
    %38 = arith.subf %34, %37 : vector<2x8x8xf32>
    %39 = math.exp %38 : vector<2x8x8xf32>
    %cst_31 = arith.constant dense<0.000000e+00> : vector<2x8xf32>
    %40 = vector.multi_reduction <add>, %39, %cst_31 [2] : vector<2x8x8xf32> to vector<2x8xf32>
    %41 = vector.shape_cast %40 : vector<2x8xf32> to vector<2x8x1xf32>
    %42 = tpu.reciprocal %41 {approx = true} : vector<2x8x1xf32> -> vector<2x8x1xf32>
    %43 = vector.broadcast %42 : vector<2x8x1xf32> to vector<2x8x8xf32>
    %44 = arith.mulf %39, %43 : vector<2x8x8xf32>
    %45 = arith.truncf %44 : vector<2x8x8xf32> to vector<2x8x8xbf16>
    "tpu.trace_start"() <{level = 10 : i32, message = "hqk,hkd->hqd"}> : () -> ()
    %cst_32 = arith.constant dense<0.000000e+00> : vector<2x8x128xf32>
    %46 = tpu.matmul %45, %33, %cst_32 {dimension_numbers = #tpu.dot_dimension_numbers<[2], [1], [1], [2], [0, 0, 0, 1, 1, 2], [0], [0]>} : vector<2x8x8xbf16>, vector<2x8x128xbf16>, vector<2x8x128xf32> -> vector<2x8x128xf32>
    "tpu.trace_stop"() : () -> ()
    %47 = arith.truncf %46 : vector<2x8x128xf32> to vector<2x8x128xbf16>
    %c0_33 = arith.constant 0 : index
    %c0_34 = arith.constant 0 : index
    %c0_35 = arith.constant 0 : index
    %c0_36 = arith.constant 0 : index
    %48 = vector.load %arg11[%c0_33, %c0_34, %c0_35, %c0_36] : memref<1x2x128x256xbf16, #tpu.memory_space<vmem>>, vector<1x2x128x256xbf16>
    %49 = vector.shape_cast %48 : vector<1x2x128x256xbf16> to vector<2x128x256xbf16>
    "tpu.trace_start"() <{level = 10 : i32, message = "hsd,hdk->hsk"}> : () -> ()
    %cst_37 = arith.constant dense<0.000000e+00> : vector<2x8x256xf32>
    %50 = tpu.matmul %47, %49, %cst_37 {dimension_numbers = #tpu.dot_dimension_numbers<[2], [1], [1], [2], [0, 0, 0, 1, 1, 2], [0], [0]>} : vector<2x8x128xbf16>, vector<2x128x256xbf16>, vector<2x8x256xf32> -> vector<2x8x256xf32>
    "tpu.trace_stop"() : () -> ()
    %cst_38 = arith.constant dense<0.000000e+00> : vector<8x256xf32>
    %51 = vector.multi_reduction <add>, %50, %cst_38 [0] : vector<2x8x256xf32> to vector<8x256xf32>
    %c0_39 = arith.constant 0 : index
    %c0_40 = arith.constant 0 : index
    %c0_41 = arith.constant 0 : index
    %52 = vector.load %arg12[%c0_39, %c0_40, %c0_41] : memref<1x1x256xf32, #tpu.memory_space<vmem>>, vector<1x1x256xf32>
    %53 = vector.shape_cast %52 : vector<1x1x256xf32> to vector<1x256xf32>
    %54 = vector.broadcast %53 : vector<1x256xf32> to vector<8x256xf32>
    %55 = arith.addf %51, %54 : vector<8x256xf32>
    %56 = arith.addf %3, %55 : vector<8x256xf32>
    %c0_42 = arith.constant 0 : index
    %c0_43 = arith.constant 0 : index
    %c0_44 = arith.constant 0 : index
    %57 = vector.load %arg13[%c0_42, %c0_43, %c0_44] : memref<1x1x256xf32, #tpu.memory_space<vmem>>, vector<1x1x256xf32>
    %58 = vector.shape_cast %57 : vector<1x1x256xf32> to vector<1x256xf32>
    %c0_45 = arith.constant 0 : index
    %c0_46 = arith.constant 0 : index
    %c0_47 = arith.constant 0 : index
    %59 = vector.load %arg14[%c0_45, %c0_46, %c0_47] : memref<1x1x256xf32, #tpu.memory_space<vmem>>, vector<1x1x256xf32>
    %60 = vector.shape_cast %59 : vector<1x1x256xf32> to vector<1x256xf32>
    %cst_48 = arith.constant dense<0.000000e+00> : vector<8xf32>
    %61 = vector.multi_reduction <add>, %56, %cst_48 [1] : vector<8x256xf32> to vector<8xf32>
    %62 = vector.shape_cast %61 : vector<8xf32> to vector<8x1xf32>
    %cst_49 = arith.constant 2.560000e+02 : f32
    %63 = vector.broadcast %cst_49 : f32 to vector<8x1xf32>
    %64 = arith.divf %62, %63 : vector<8x1xf32>
    %65 = vector.broadcast %64 : vector<8x1xf32> to vector<8x256xf32>
    %66 = arith.subf %56, %65 : vector<8x256xf32>
    %67 = arith.mulf %66, %66 : vector<8x256xf32>
    %cst_50 = arith.constant dense<0.000000e+00> : vector<8xf32>
    %68 = vector.multi_reduction <add>, %67, %cst_50 [1] : vector<8x256xf32> to vector<8xf32>
    %69 = vector.shape_cast %68 : vector<8xf32> to vector<8x1xf32>
    %cst_51 = arith.constant 2.560000e+02 : f32
    %70 = vector.broadcast %cst_51 : f32 to vector<8x1xf32>
    %71 = arith.divf %69, %70 : vector<8x1xf32>
    %72 = vector.broadcast %64 : vector<8x1xf32> to vector<8x256xf32>
    %73 = arith.subf %56, %72 : vector<8x256xf32>
    %cst_52 = arith.constant 9.99999974E-6 : f32
    %74 = vector.broadcast %cst_52 : f32 to vector<8x1xf32>
    %75 = arith.addf %71, %74 : vector<8x1xf32>
    %76 = math.rsqrt %75 : vector<8x1xf32>
    %77 = vector.broadcast %76 : vector<8x1xf32> to vector<8x256xf32>
    %78 = arith.mulf %73, %77 : vector<8x256xf32>
    %79 = vector.broadcast %58 : vector<1x256xf32> to vector<8x256xf32>
    %80 = arith.mulf %78, %79 : vector<8x256xf32>
    %81 = vector.broadcast %60 : vector<1x256xf32> to vector<8x256xf32>
    %82 = arith.addf %80, %81 : vector<8x256xf32>
    %83 = arith.truncf %82 : vector<8x256xf32> to vector<8x256xbf16>
    %c0_53 = arith.constant 0 : index
    %c0_54 = arith.constant 0 : index
    %c0_55 = arith.constant 0 : index
    %84 = vector.load %arg15[%c0_53, %c0_54, %c0_55] : memref<1x256x512xbf16, #tpu.memory_space<vmem>>, vector<1x256x512xbf16>
    %85 = vector.shape_cast %84 : vector<1x256x512xbf16> to vector<256x512xbf16>
    %cst_56 = arith.constant dense<0.000000e+00> : vector<8x512xf32>
    %86 = tpu.matmul %83, %85, %cst_56 {dimension_numbers = #tpu.dot_dimension_numbers<[1], [0], [0], [1], [0, 0, 1, 1], [], []>} : vector<8x256xbf16>, vector<256x512xbf16>, vector<8x512xf32> -> vector<8x512xf32>
    %c0_57 = arith.constant 0 : index
    %c0_58 = arith.constant 0 : index
    %c0_59 = arith.constant 0 : index
    %87 = vector.load %arg16[%c0_57, %c0_58, %c0_59] : memref<1x1x512xf32, #tpu.memory_space<vmem>>, vector<1x1x512xf32>
    %88 = vector.shape_cast %87 : vector<1x1x512xf32> to vector<1x512xf32>
    %89 = vector.broadcast %88 : vector<1x512xf32> to vector<8x512xf32>
    %90 = arith.addf %86, %89 : vector<8x512xf32>
    %cst_60 = arith.constant 0.000000e+00 : f32
    %91 = vector.broadcast %cst_60 : f32 to vector<8x512xf32>
    %92 = arith.maximumf %90, %91 : vector<8x512xf32>
    %93 = arith.truncf %92 : vector<8x512xf32> to vector<8x512xbf16>
    %c0_61 = arith.constant 0 : index
    %c0_62 = arith.constant 0 : index
    %c0_63 = arith.constant 0 : index
    %94 = vector.load %arg17[%c0_61, %c0_62, %c0_63] : memref<1x512x256xbf16, #tpu.memory_space<vmem>>, vector<1x512x256xbf16>
    %95 = vector.shape_cast %94 : vector<1x512x256xbf16> to vector<512x256xbf16>
    %cst_64 = arith.constant dense<0.000000e+00> : vector<8x256xf32>
    %96 = tpu.matmul %93, %95, %cst_64 {dimension_numbers = #tpu.dot_dimension_numbers<[1], [0], [0], [1], [0, 0, 1, 1], [], []>} : vector<8x512xbf16>, vector<512x256xbf16>, vector<8x256xf32> -> vector<8x256xf32>
    %c0_65 = arith.constant 0 : index
    %c0_66 = arith.constant 0 : index
    %c0_67 = arith.constant 0 : index
    %97 = vector.load %arg18[%c0_65, %c0_66, %c0_67] : memref<1x1x256xf32, #tpu.memory_space<vmem>>, vector<1x1x256xf32>
    %98 = vector.shape_cast %97 : vector<1x1x256xf32> to vector<1x256xf32>
    %99 = vector.broadcast %98 : vector<1x256xf32> to vector<8x256xf32>
    %100 = arith.addf %96, %99 : vector<8x256xf32>
    %101 = arith.addf %82, %100 : vector<8x256xf32>
    %c0_68 = arith.constant 0 : index
    %c0_69 = arith.constant 0 : index
    %c0_70 = arith.constant 0 : index
    %102 = vector.load %arg19[%c0_68, %c0_69, %c0_70] : memref<1x1x256xf32, #tpu.memory_space<vmem>>, vector<1x1x256xf32>
    %103 = vector.shape_cast %102 : vector<1x1x256xf32> to vector<1x256xf32>
    %c0_71 = arith.constant 0 : index
    %c0_72 = arith.constant 0 : index
    %c0_73 = arith.constant 0 : index
    %104 = vector.load %arg20[%c0_71, %c0_72, %c0_73] : memref<1x1x256xf32, #tpu.memory_space<vmem>>, vector<1x1x256xf32>
    %105 = vector.shape_cast %104 : vector<1x1x256xf32> to vector<1x256xf32>
    %cst_74 = arith.constant dense<0.000000e+00> : vector<8xf32>
    %106 = vector.multi_reduction <add>, %101, %cst_74 [1] : vector<8x256xf32> to vector<8xf32>
    %107 = vector.shape_cast %106 : vector<8xf32> to vector<8x1xf32>
    %cst_75 = arith.constant 2.560000e+02 : f32
    %108 = vector.broadcast %cst_75 : f32 to vector<8x1xf32>
    %109 = arith.divf %107, %108 : vector<8x1xf32>
    %110 = vector.broadcast %109 : vector<8x1xf32> to vector<8x256xf32>
    %111 = arith.subf %101, %110 : vector<8x256xf32>
    %112 = arith.mulf %111, %111 : vector<8x256xf32>
    %cst_76 = arith.constant dense<0.000000e+00> : vector<8xf32>
    %113 = vector.multi_reduction <add>, %112, %cst_76 [1] : vector<8x256xf32> to vector<8xf32>
    %114 = vector.shape_cast %113 : vector<8xf32> to vector<8x1xf32>
    %cst_77 = arith.constant 2.560000e+02 : f32
    %115 = vector.broadcast %cst_77 : f32 to vector<8x1xf32>
    %116 = arith.divf %114, %115 : vector<8x1xf32>
    %117 = vector.broadcast %109 : vector<8x1xf32> to vector<8x256xf32>
    %118 = arith.subf %101, %117 : vector<8x256xf32>
    %cst_78 = arith.constant 9.99999974E-6 : f32
    %119 = vector.broadcast %cst_78 : f32 to vector<8x1xf32>
    %120 = arith.addf %116, %119 : vector<8x1xf32>
    %121 = math.rsqrt %120 : vector<8x1xf32>
    %122 = vector.broadcast %121 : vector<8x1xf32> to vector<8x256xf32>
    %123 = arith.mulf %118, %122 : vector<8x256xf32>
    %124 = vector.broadcast %103 : vector<1x256xf32> to vector<8x256xf32>
    %125 = arith.mulf %123, %124 : vector<8x256xf32>
    %126 = vector.broadcast %105 : vector<1x256xf32> to vector<8x256xf32>
    %127 = arith.addf %125, %126 : vector<8x256xf32>
    %c0_79 = arith.constant 0 : index
    %c0_80 = arith.constant 0 : index
    %128 = vector.load %arg22[%c0_79, %c0_80] : memref<8x256xf32, #tpu.memory_space<vmem>>, vector<8x256xf32>
    tpu.vector_store %arg22[%c0_79, %c0_80], %127 {strides = array<i32>} : memref<8x256xf32, #tpu.memory_space<vmem>>, vector<8x256xf32>,
    %c1_i32 = arith.constant 1 : i32
    %129 = arith.cmpi eq, %arg1, %c1_i32 : i32
    %130 = arith.extui %129 : i1 to i32
    %c0_i32_81 = arith.constant 0 : i32
    %131 = arith.cmpi ne, %130, %c0_i32_81 : i32
    scf.if %131 {
      %c0_82 = arith.constant 0 : index
      %c0_83 = arith.constant 0 : index
      %c0_84 = arith.constant 0 : index
      %132 = vector.load %arg21[%c0_82, %c0_83, %c0_84] : memref<1x8x256xf32, #tpu.memory_space<vmem>>, vector<1x8x256xf32>
      %133 = vector.shape_cast %132 : vector<1x8x256xf32> to vector<8x256xf32>
      %134 = vector.shape_cast %127 : vector<8x256xf32> to vector<1x8x256xf32>
      tpu.vector_store %arg21[%c0_82, %c0_83, %c0_84], %134 {strides = array<i32>} : memref<1x8x256xf32, #tpu.memory_space<vmem>>, vector<1x8x256xf32>,
    } else {
    }
    return
  }
  func.func @transform_0(%arg0: i32, %arg1: i32) -> (i32, i32, i32) {
    %c0_i32 = arith.constant 0 : i32
    %c0_i32_0 = arith.constant 0 : i32
    %c0_i32_1 = arith.constant 0 : i32
    return %arg0, %c0_i32, %c0_i32_0 : i32, i32, i32
  }
  func.func @transform_1(%arg0: i32, %arg1: i32) -> (i32, i32) {
    %c0_i32 = arith.constant 0 : i32
    %c0_i32_0 = arith.constant 0 : i32
    %c0_i32_1 = arith.constant 0 : i32
    return %c0_i32, %c0_i32_0 : i32, i32
  }
  func.func @transform_2(%arg0: i32, %arg1: i32) -> (i32, i32) {
    %c0_i32 = arith.constant 0 : i32
    %c0_i32_0 = arith.constant 0 : i32
    %c0_i32_1 = arith.constant 0 : i32
    return %c0_i32, %c0_i32_0 : i32, i32
  }
  func.func @transform_3(%arg0: i32, %arg1: i32) -> (i32, i32, i32, i32) {
    %c0_i32 = arith.constant 0 : i32
    %c0_i32_0 = arith.constant 0 : i32
    %c0_i32_1 = arith.constant 0 : i32
    %c0_i32_2 = arith.constant 0 : i32
    return %arg1, %c0_i32, %c0_i32_0, %c0_i32_1 : i32, i32, i32, i32
  }
  func.func @transform_4(%arg0: i32, %arg1: i32) -> (i32, i32, i32, i32) {
    %c0_i32 = arith.constant 0 : i32
    %c0_i32_0 = arith.constant 0 : i32
    %c0_i32_1 = arith.constant 0 : i32
    %c0_i32_2 = arith.constant 0 : i32
    return %arg1, %c0_i32, %c0_i32_0, %c0_i32_1 : i32, i32, i32, i32
  }
  func.func @transform_5(%arg0: i32, %arg1: i32) -> (i32, i32, i32, i32) {
    %c0_i32 = arith.constant 0 : i32
    %c0_i32_0 = arith.constant 0 : i32
    %c0_i32_1 = arith.constant 0 : i32
    %c0_i32_2 = arith.constant 0 : i32
    return %arg1, %c0_i32, %c0_i32_0, %c0_i32_1 : i32, i32, i32, i32
  }
  func.func @transform_6(%arg0: i32, %arg1: i32) -> (i32, i32, i32, i32) {
    %c0_i32 = arith.constant 0 : i32
    %c0_i32_0 = arith.constant 0 : i32
    %c0_i32_1 = arith.constant 0 : i32
    %c0_i32_2 = arith.constant 0 : i32
    return %arg1, %c0_i32, %c0_i32_0, %c0_i32_1 : i32, i32, i32, i32
  }
  func.func @transform_7(%arg0: i32, %arg1: i32) -> (i32, i32, i32, i32) {
    %c0_i32 = arith.constant 0 : i32
    %c0_i32_0 = arith.constant 0 : i32
    %c0_i32_1 = arith.constant 0 : i32
    %c0_i32_2 = arith.constant 0 : i32
    return %arg1, %c0_i32, %c0_i32_0, %c0_i32_1 : i32, i32, i32, i32
  }
  func.func @transform_8(%arg0: i32, %arg1: i32) -> (i32, i32, i32, i32) {
    %c0_i32 = arith.constant 0 : i32
    %c0_i32_0 = arith.constant 0 : i32
    %c0_i32_1 = arith.constant 0 : i32
    %c0_i32_2 = arith.constant 0 : i32
    return %arg1, %c0_i32, %c0_i32_0, %c0_i32_1 : i32, i32, i32, i32
  }
  func.func @transform_9(%arg0: i32, %arg1: i32) -> (i32, i32, i32, i32) {
    %c0_i32 = arith.constant 0 : i32
    %c0_i32_0 = arith.constant 0 : i32
    %c0_i32_1 = arith.constant 0 : i32
    %c0_i32_2 = arith.constant 0 : i32
    return %arg1, %c0_i32, %c0_i32_0, %c0_i32_1 : i32, i32, i32, i32
  }
  func.func @transform_10(%arg0: i32, %arg1: i32) -> (i32, i32, i32) {
    %c0_i32 = arith.constant 0 : i32
    %c0_i32_0 = arith.constant 0 : i32
    %c0_i32_1 = arith.constant 0 : i32
    return %arg1, %c0_i32, %c0_i32_0 : i32, i32, i32
  }
  func.func @transform_11(%arg0: i32, %arg1: i32) -> (i32, i32, i32) {
    %c0_i32 = arith.constant 0 : i32
    %c0_i32_0 = arith.constant 0 : i32
    %c0_i32_1 = arith.constant 0 : i32
    return %arg1, %c0_i32, %c0_i32_0 : i32, i32, i32
  }
  func.func @transform_12(%arg0: i32, %arg1: i32) -> (i32, i32, i32) {
    %c0_i32 = arith.constant 0 : i32
    %c0_i32_0 = arith.constant 0 : i32
    %c0_i32_1 = arith.constant 0 : i32
    return %arg1, %c0_i32, %c0_i32_0 : i32, i32, i32
  }
  func.func @transform_13(%arg0: i32, %arg1: i32) -> (i32, i32, i32) {
    %c0_i32 = arith.constant 0 : i32
    %c0_i32_0 = arith.constant 0 : i32
    %c0_i32_1 = arith.constant 0 : i32
    return %arg1, %c0_i32, %c0_i32_0 : i32, i32, i32
  }
  func.func @transform_14(%arg0: i32, %arg1: i32) -> (i32, i32, i32) {
    %c0_i32 = arith.constant 0 : i32
    %c0_i32_0 = arith.constant 0 : i32
    %c0_i32_1 = arith.constant 0 : i32
    return %arg1, %c0_i32, %c0_i32_0 : i32, i32, i32
  }
  func.func @transform_15(%arg0: i32, %arg1: i32) -> (i32, i32, i32) {
    %c0_i32 = arith.constant 0 : i32
    %c0_i32_0 = arith.constant 0 : i32
    %c0_i32_1 = arith.constant 0 : i32
    return %arg1, %c0_i32, %c0_i32_0 : i32, i32, i32
  }
  func.func @transform_16(%arg0: i32, %arg1: i32) -> (i32, i32, i32) {
    %c0_i32 = arith.constant 0 : i32
    %c0_i32_0 = arith.constant 0 : i32
    %c0_i32_1 = arith.constant 0 : i32
    return %arg1, %c0_i32, %c0_i32_0 : i32, i32, i32
  }
  func.func @transform_17(%arg0: i32, %arg1: i32) -> (i32, i32, i32) {
    %c0_i32 = arith.constant 0 : i32
    %c0_i32_0 = arith.constant 0 : i32
    %c0_i32_1 = arith.constant 0 : i32
    return %arg1, %c0_i32, %c0_i32_0 : i32, i32, i32
  }
  func.func @transform_18(%arg0: i32, %arg1: i32) -> (i32, i32, i32) {
    %c0_i32 = arith.constant 0 : i32
    %c0_i32_0 = arith.constant 0 : i32
    %c0_i32_1 = arith.constant 0 : i32
    return %arg1, %c0_i32, %c0_i32_0 : i32, i32, i32
  }
  func.func @transform_19(%arg0: i32, %arg1: i32) -> (i32, i32, i32) {
    %c0_i32 = arith.constant 0 : i32
    %c0_i32_0 = arith.constant 0 : i32
    %c0_i32_1 = arith.constant 0 : i32
    return %arg0, %c0_i32, %c0_i32_0 : i32, i32, i32
  }
}

</mosaic_0001>

<bundles_post_ra>
// kernel: tpu_custom_call.1
= control target key start
LH: loop header
LB: loop body
LE: loop exit
PB: predicated region body
PF: predicated region fallthrough
CT: control target
= control target key end

     0   :  { %s6660_s0 = inlined_call_operand.hbm [shape: f32[2,8,8], index: 0, kind: input, shape index: {}]   ;;  %s6661_s1 = inlined_call_operand.hbm [shape: bf16[8,256], index: 1, kind: input, shape index: {}]   ;;  %s6662_s2 = inlined_call_operand.hbm [shape: f32[1,256], index: 2, kind: input, shape index: {}]   ;;  %s6663_s3 = inlined_call_operand.hbm [shape: bf16[2,2,256,128], index: 3, kind: input, shape index: {}]   ;;  %s6664_s4 = inlined_call_operand.vmem [shape: f32[2,2,1,128], index: 4, kind: input, shape index: {}]   ;;  %s6665_s5 = inlined_call_operand.hbm [shape: bf16[2,2,256,128], index: 5, kind: input, shape index: {}]   ;;  %s6666_s6 = inlined_call_operand.vmem [shape: f32[2,2,1,128], index: 6, kind: input, shape index: {}]   ;;  %s6667_s7 = inlined_call_operand.hbm [shape: bf16[2,2,256,128], index: 7, kind: input, shape index: {}]   ;;  %s6668_s8 = inlined_call_operand.vmem [shape: f32[2,2,1,128], index: 8, kind: input, shape index: {}]   ;;  %s6669_s9 = inlined_call_operand.hbm [shape: bf16[2,2,128,256], index: 9, kind: input, shape index: {}]   ;;  %s6670_s10 = inlined_call_operand.vmem [shape: f32[2,1,256], index: 10, kind: input, shape index: {}]   ;;  %s6671_s11 = inlined_call_operand.vmem [shape: f32[2,1,256], index: 11, kind: input, shape index: {}]   ;;  %s6672_s12 = inlined_call_operand.vmem [shape: f32[2,1,256], index: 12, kind: input, shape index: {}]   ;;  %s6673_s13 = inlined_call_operand.hbm [shape: bf16[2,256,512], index: 13, kind: input, shape index: {}]   ;;  %s6674_s14 = inlined_call_operand.vmem [shape: f32[2,1,512], index: 14, kind: input, shape index: {}]   ;;  %s6675_s15 = inlined_call_operand.hbm [shape: bf16[2,512,256], index: 15, kind: input, shape index: {}]   ;;  %s6676_s16 = inlined_call_operand.vmem [shape: f32[2,1,256], index: 16, kind: input, shape index: {}]   ;;  %s6677_s17 = inlined_call_operand.vmem [shape: f32[2,1,256], index: 17, kind: input, shape index: {}]   ;;  %s6678_s18 = inlined_call_operand.vmem [shape: f32[2,1,256], index: 18, kind: input, shape index: {}]   ;;  %s6679_s19 = inlined_call_operand.hbm [shape: f32[2,8,256], index: 19, kind: output, shape index: {}]  }
   0x1   :  { %6742 = sst [smem:[#allocation52_spill]] %s6660_s0 }
   0x2   :  { %6743 = sst [smem:[#allocation53_spill]] %s6661_s1 }
   0x3   :  { %6744 = sst [smem:[#allocation54_spill]] %s6662_s2 }
   0x4   :  { %6745 = sst [smem:[#allocation55_spill]] %s6663_s3 }
   0x5   :  { %6746 = sst [smem:[#allocation56_spill]] %s6664_s4 }
   0x6   :  { %6747 = sst [smem:[#allocation57_spill]] %s6665_s5 }
   0x7   :  { %6748 = sst [smem:[#allocation58_spill]] %s6666_s6 }
   0x8   :  { %6749 = sst [smem:[#allocation59_spill]] %s6667_s7 }
   0x9   :  { %6750 = sst [smem:[#allocation60_spill]] %s6668_s8 }
   0xa   :  { %6751 = sst [smem:[#allocation61_spill]] %s6669_s9 }
   0xb   :  { %6752 = sst [smem:[#allocation62_spill]] %s6670_s10 }
   0xc   :  { %6753 = sst [smem:[#allocation63_spill]] %s6671_s11 }
   0xd   :  { %6754 = sst [smem:[#allocation64_spill]] %s6672_s12 }
   0xe   :  { %6755 = sst [smem:[#allocation65_spill]] %s6673_s13 }
   0xf   :  { %6756 = sst [smem:[#allocation66_spill]] %s6674_s14 }
  0x10   :  { %6757 = sst [smem:[#allocation67_spill]] %s6675_s15 }
  0x11   :  { %6758 = sst [smem:[#allocation68_spill]] %s6676_s16 }
  0x12   :  { %6759 = sst [smem:[#allocation69_spill]] %s6677_s17 }
  0x13   :  { %6760 = sst [smem:[#allocation70_spill]] %s6678_s18 }
  0x14   :  { %6761 = sst [smem:[#allocation71_spill]] %s6679_s19 }
  0x15   :  { %24 = vsyncpa [#allocation4], 0 }
  0x16   :  { %26 = vsyncpa [#allocation4 + $0x1], 0 }
  0x17   :  { %27 = vsyncpa [#allocation7], 0 }
  0x18   :  { %28 = vsyncpa [#allocation10], 0 }
  0x19   :  { %30 = vsyncpa [#allocation10 + $0x1], 0 }
  0x1a   :  { %31 = vsyncpa [#allocation13], 0 }
  0x1b   :  { %33 = vsyncpa [#allocation13 + $0x1], 0 }
  0x1c   :  { %34 = vsyncpa [#allocation16], 0 }
  0x1d   :  { %36 = vsyncpa [#allocation16 + $0x1], 0 }
  0x1e   :  { %37 = vsyncpa [#allocation5], 0 }
  0x1f   :  { %39 = vsyncpa [#allocation5 + $0x1], 0  ;;  %s5662_s0 = smov 0   ;;  %s5664_s30 = smov 0  }
  0x20   :  { %s5666_s20 = smov 0   ;;  %s5668_s21 = smov 0  }
  0x21   :  { %s5670_s1 = smov 0   ;;  %s5672_s22 = smov 0  }
  0x22   :  { %s5674_s2 = smov 0   ;;  %s5676_s23 = smov 0  }
  0x23   :  { %s5678_s24 = smov 0   ;;  %s5680_s25 = smov 0  }
  0x24   :  { %s5682_s3 = smov 0  }
  0x25 LB: > { %6762 = sst [smem:[#allocation25_spill]] %s5504_s30  ;;  %s5716_s26 = sadd.s32 4294967295, %s5540_s3   ;;  %s5540_s3 = sphi %s5682_s3, %s45_s3   ;;  %s5536_s25 = sphi %s5680_s25, %s6883_s25   ;;  %s5532_s24 = sphi %s5678_s24, %s6882_s24   ;;  %s5528_s23 = sphi %s5676_s23, %s6881_s23   ;;  %s5524_s2 = sphi %s5674_s2, %s6880_s2   ;;  %s5520_s22 = sphi %s5672_s22, %s6879_s22   ;;  %s5516_s1 = sphi %s5670_s1, %s6878_s1   ;;  %s5512_s21 = sphi %s5668_s21, %s6877_s21   ;;  %s5508_s20 = sphi %s5666_s20, %s6876_s20   ;;  %s5504_s30 = sphi %s5664_s30, %s6875_s30   ;;  %s5500_s0 = sphi %s5662_s0, %s6874_s0  }
  0x26   : > { %6763 = sst [smem:[#allocation26_spill]] %s5508_s20  ;;  %p6687_p0 = scmp.eq.s32.totalorder %s5540_s3, 0 }
  0x27   : > { %6764 = sst [smem:[#allocation27_spill]] %s5512_s21  ;;  %p6686_p1 = scmp.eq.s32.totalorder %s5716_s26, 0 }
  0x28   : > { %6765 = sst [smem:[#allocation28_spill]] %s5516_s1  ;;  %p139_p2 = scmp.ne.s32.totalorder %s5508_s20, %s5504_s30 }
  0x29   : > { %6766 = sst [smem:[#allocation29_spill]] %s5520_s22  ;;  %p145_p3 = scmp.ne.s32.totalorder %s5504_s30, %s5500_s0 }
  0x2a   : > { %6767 = sst [smem:[#allocation30_spill]] %s5524_s2  ;;  %p4130_p5 = scmp.ge.s32.totalorder %s5540_s3, 1 }
  0x2b   : > { %6768 = sst [smem:[#allocation31_spill]] %s5528_s23  ;;  %p141_p6 = por %p139_p2, %p6687_p0 }
  0x2c   : > { %6769 = sst [smem:[#allocation32_spill]] %s5532_s24  ;;  %p5730_p7 = por %p145_p3, %p6686_p1 }
  0x2d   : > { %6770 = sst [smem:[#allocation33_spill]] %s5536_s25  ;;  %p572_p8 = scmp.lt.s32.totalorder %s5540_s3, 5 }
  0x2e   : > { %6771 = sst [smem:[#allocation34_spill]] %s5540_s3  ;;  %s5542_s27 = smov [#allocation6]  }
  0x2f   : > { %s6772_s28 = scalar_select %p5730_p7, 1, 0 }
  0x30   : > { %p5735_p9 = pnand %p4130_p5, %p572_p8  ;;  %s585_s19 = sshll.u32 %s5542_s27, 4  ;;  %s586_s19 = int_to_ptr.vmem [resolvable:$true] %s585_s19 }
  0x31   : > { %6773 = sst [smem:[#allocation35_spill]] %s6772_s28  ;;  %p6685_p10 = scmp.lt.s32.totalorder %s5540_s3, 4 }
  0x32   : > { %s6774_s29 = scalar_select %p5735_p9, 1, 0 }
  0x33   : > { %p4645_p11 = pneg %p5735_p9  ;;  %p5744_p12 = pnand %p6685_p10, %p141_p6 }
  0x34   : > { %6775 = sst [smem:[#allocation36_spill]] %s6774_s29  ;;  %s5755_s18 = sand.u32 1, %s5540_s3  }
  0x35   : > { %s6776_s0 = scalar_select %p5744_p12, 1, 0 }
  0x36   : > { %p5750_p13 = pnand %p4645_p11, %p6686_p1  ;;  %6779 = sst [smem:[#allocation38_spill]] %s5755_s18 }
  0x37   : > { %6777 = sst [smem:[#allocation37_spill]] %s6776_s0  ;;  %s6780_s14 = sld [smem:[#allocation53_spill]] }
  0x38   : > { %s6778_s23 = scalar_select %p5750_p13, 1, 0 }
  0x39   : > { %p6695_p3 = pneg %p5750_p13 }
  0x3d   : > { %s5136_s12 = scalar_lea.hbm %s6780_s14, 128 }
  0x3e   : > { %p5137_p2 = scmp.ne.s32.totalorder %s6780_s14, %s5136_s12  ;;  %p5143_p8 = scmp.lt.u32.totalorder %s5136_s12, %s6780_s14 }
  0x40   : > { %p5139_p5 = pnand %p6695_p3, %p5137_p2 }
  0x42   : > { %p5140_p6 = pneg %p5139_p5 }
  0x44   : > { %p5145_p11 = pnand %p5143_p8, %p5140_p6 }
  0x46   : > { %5148 = shalt.err (!%p5145_p11)
}
  0x47   : > { %s5149_s17 = scalar_lea.vmem %s586_s19, 128  ;;  %p5157_p0 = scmp.lt.s32.totalorder %s586_s19, %s586_s19 }
  0x48   : > { %p5150_p10 = scmp.ne.s32.totalorder %s586_s19, %s5149_s17  ;;  %p5158_p7 = scmp.lt.s32.totalorder %s5149_s17, %s5149_s17 }
  0x4a   : > { %p5152_p4 = pnand %p5150_p10, %p6695_p3  ;;  %p5159_p9 = por %p5158_p7, %p5157_p0 }
  0x4c   : > { %p5153_p1 = pneg %p5152_p4 }
  0x4e   : > { %p5160_p12 = pnand %p5159_p9, %p5153_p1 }
  0x50   : > { %5163 = shalt.err (!%p5160_p12)
}
  0x51   : > { %4648 = dma.hbm_to_vmem [thread:$0]  (!%p5750_p13), %s6780_s14, 128, %s586_s19, [#allocation7]  }
  0x52   : > { %s6781_s6 = sand.u32 1, %s5508_s20   ;;  %s5785_s12 = sshll.u32 %s5532_s24, 12 }
  0x53   : > { %s5782_s8 = sshll.u32 %s6781_s6, 8  ;;  %s6783_s27 = sld [smem:[#allocation55_spill]] }
  0x54   : > { %6782 = sst [smem:[#allocation39_spill]] %s5782_s8  ;;  %s629_s10 = scalar_lea.vmem [#allocation9], %s5782_s8 }
  0x55   : > { %s636_s11 = sshll.u32 %s629_s10, 4  ;;  %p6784_p1 = scmp.ne.s32.totalorder %s6776_s0, 0  ;;  %s5794_s11 = int_to_ptr.vmem [resolvable:$true] %s636_s11 }
  0x57   : > { %p5801_p4 = pneg %p6784_p1 }
  0x59   : > { %s5791_s4 = scalar_lea.hbm %s6783_s27, %s5785_s12  ;;  %s5169_s2 = scalar_lea.hbm %s6783_s27, 8192 }
  0x5a   : > { %s5164_s6 = scalar_lea.hbm %s5791_s4, 4096  ;;  %p5170_p10 = scmp.lt.u32.totalorder %s5791_s4, %s6783_s27 }
  0x5b   : > { %p5165_p0 = scmp.ne.s32.totalorder %s5791_s4, %s5164_s6  ;;  %p5171_p12 = scmp.lt.u32.totalorder %s5169_s2, %s5164_s6 }
  0x5c   : > { %s6785_s14 = scalar_select %p5801_p4, 1, 0 }
  0x5d   : > { %p5167_p7 = pnand %p5801_p4, %p5165_p0  ;;  %p5172_p2 = por %p5171_p12, %p5170_p10 }
  0x5e   : > { %6786 = sst [smem:[#allocation40_spill]] %s6785_s14  ;;  %p5173_p5 = scmp.lt.u32.totalorder %s5164_s6, %s5791_s4 }
  0x5f   : > { %p5168_p9 = pneg %p5167_p7 }
  0x60   : > { %p5174_p6 = por %p5173_p5, %p5172_p2 }
  0x62   : > { %p5175_p8 = pnand %p5174_p6, %p5168_p9 }
  0x64   : > { %5178 = shalt.err (!%p5175_p8)
}
  0x65   : > { %s5179_s19 = scalar_lea.vmem %s5794_s11, 4096  ;;  %s5543_s16 = smov [#allocation9]  }
  0x66   : > { %p5180_p11 = scmp.ne.s32.totalorder %s5794_s11, %s5179_s19  ;;  %s5184_s17 = sshll.u32 %s5543_s16, 4  ;;  %s5185_s17 = int_to_ptr.vmem [resolvable:$false] %s5184_s17 }
  0x67   : > { %s5186_s28 = scalar_lea.vmem %s5185_s17, 8192  ;;  %p5187_p3 = scmp.lt.s32.totalorder %s5794_s11, %s5185_s17 }
  0x68   : > { %p5182_p0 = pnand %p5180_p11, %p5801_p4  ;;  %p5188_p13 = scmp.lt.s32.totalorder %s5186_s28, %s5179_s19 }
  0x6a   : > { %p5183_p7 = pneg %p5182_p0  ;;  %p5189_p10 = por %p5188_p13, %p5187_p3 }
  0x6c   : > { %p5190_p12 = pnand %p5189_p10, %p5183_p7 }
  0x6e   : > { %5193 = shalt.err (!%p5190_p12)
}
  0x6f   : > { %s6702_s2 = smov 64   ;;  %s6703_s6 = smov 4  }
  0x70   : > { %s6787_s10 = scalar_lea.sflag [#allocation10], %s5755_s18  ;;  %s6788_s7 = sld [smem:[#allocation59_spill]] }
  0x71   : > { %4658 = dma.hbm_to_vmem [thread:$0]  (!%p6784_p1), %s5791_s4, 4096, %s5794_s11, %s6787_s10, %s6702_s2, %s6702_s2, %s6703_s6  }
  0x72   : > { %s685_s28 = scalar_lea.vmem [#allocation12], %s5782_s8  ;;  %s6701_s30 = scalar_lea.sflag [#allocation13], %s5755_s18 }
  0x73   : > { %s692_s27 = sshll.u32 %s685_s28, 4  ;;  %s5836_s27 = int_to_ptr.vmem [resolvable:$true] %s692_s27 }
  0x76   : > { %s5833_s17 = scalar_lea.hbm %s6788_s7, %s5785_s12  ;;  %s5199_s10 = scalar_lea.hbm %s6788_s7, 8192 }
  0x77   : > { %s5194_s29 = scalar_lea.hbm %s5833_s17, 4096  ;;  %p5200_p2 = scmp.lt.u32.totalorder %s5833_s17, %s6788_s7 }
  0x78   : > { %p5195_p13 = scmp.ne.s32.totalorder %s5833_s17, %s5194_s29  ;;  %p5201_p5 = scmp.lt.u32.totalorder %s5199_s10, %s5194_s29 }
  0x79   : > { %p5203_p8 = scmp.lt.u32.totalorder %s5194_s29, %s5833_s17 }
  0x7a   : > { %p5197_p3 = pnand %p5195_p13, %p5801_p4  ;;  %p5202_p6 = por %p5201_p5, %p5200_p2 }
  0x7c   : > { %p5198_p9 = pneg %p5197_p3  ;;  %p5204_p11 = por %p5203_p8, %p5202_p6 }
  0x7e   : > { %p5205_p0 = pnand %p5204_p11, %p5198_p9 }
  0x80   : > { %5208 = shalt.err (!%p5205_p0)
}
  0x81   : > { %s5209_s28 = scalar_lea.vmem %s5836_s27, 4096  ;;  %s5546_s4 = smov [#allocation12]  }
  0x82   : > { %p5210_p7 = scmp.ne.s32.totalorder %s5836_s27, %s5209_s28  ;;  %s5214_s11 = sshll.u32 %s5546_s4, 4  ;;  %s5215_s11 = int_to_ptr.vmem [resolvable:$false] %s5214_s11 }
  0x83   : > { %s5216_s19 = scalar_lea.vmem %s5215_s11, 8192  ;;  %p5217_p13 = scmp.lt.s32.totalorder %s5836_s27, %s5215_s11 }
  0x84   : > { %p5212_p10 = pnand %p5210_p7, %p5801_p4  ;;  %p5218_p3 = scmp.lt.s32.totalorder %s5216_s19, %s5209_s28 }
  0x86   : > { %p5213_p12 = pneg %p5212_p10  ;;  %p5219_p2 = por %p5218_p3, %p5217_p13 }
  0x88   : > { %p5220_p5 = pnand %p5219_p2, %p5213_p12 }
  0x8a   : > { %5223 = shalt.err (!%p5220_p5)
}
  0x8b   : > { %4664 = dma.hbm_to_vmem [thread:$0]  (!%p6784_p1), %s5833_s17, 4096, %s5836_s27, %s6701_s30, %s6702_s2, %s6702_s2, %s6703_s6  }
  0x8c   : > { %s6789_s29 = sand.u32 1, %s5508_s20   ;;  %s4454_s16 = sshll.u32 %s5532_s24, 13 }
  0x8d   : > { %s5867_s10 = sshll.u32 %s6789_s29, 9  ;;  %s6790_s13 = sld [smem:[#allocation65_spill]] }
  0x8e   : > { %s755_s19 = scalar_lea.vmem [#allocation15], %s5867_s10  ;;  %s6717_s27 = scalar_lea.sflag [#allocation16], %s5755_s18 }
  0x8f   : > { %s762_s7 = sshll.u32 %s755_s19, 4  ;;  %s5878_s7 = int_to_ptr.vmem [resolvable:$true] %s762_s7 }
  0x93   : > { %s5875_s11 = scalar_lea.hbm %s6790_s13, %s4454_s16  ;;  %s5229_s28 = scalar_lea.hbm %s6790_s13, 16384 }
  0x94   : > { %s5224_s17 = scalar_lea.hbm %s5875_s11, 8192  ;;  %p5230_p11 = scmp.lt.u32.totalorder %s5875_s11, %s6790_s13 }
  0x95   : > { %p5225_p9 = scmp.ne.s32.totalorder %s5875_s11, %s5224_s17  ;;  %p5231_p0 = scmp.lt.u32.totalorder %s5229_s28, %s5224_s17 }
  0x96   : > { %p5233_p10 = scmp.lt.u32.totalorder %s5224_s17, %s5875_s11 }
  0x97   : > { %p5227_p6 = pnand %p5225_p9, %p5801_p4  ;;  %p5232_p7 = por %p5231_p0, %p5230_p11 }
  0x99   : > { %p5228_p8 = pneg %p5227_p6  ;;  %p5234_p12 = por %p5233_p10, %p5232_p7 }
  0x9b   : > { %p5235_p13 = pnand %p5234_p12, %p5228_p8 }
  0x9d   : > { %5238 = shalt.err (!%p5235_p13)
}
  0x9e   : > { %s5239_s19 = scalar_lea.vmem %s5878_s7, 8192  ;;  %s5547_s30 = smov [#allocation15]  }
  0x9f   : > { %p5240_p3 = scmp.ne.s32.totalorder %s5878_s7, %s5239_s19  ;;  %s5244_s29 = sshll.u32 %s5547_s30, 4  ;;  %s5245_s29 = int_to_ptr.vmem [resolvable:$false] %s5244_s29 }
  0xa0   : > { %s5246_s2 = scalar_lea.vmem %s5245_s29, 16384  ;;  %p5247_p9 = scmp.lt.s32.totalorder %s5878_s7, %s5245_s29 }
  0xa1   : > { %p5242_p2 = pnand %p5240_p3, %p5801_p4  ;;  %p5248_p6 = scmp.lt.s32.totalorder %s5246_s2, %s5239_s19 }
  0xa3   : > { %p5243_p5 = pneg %p5242_p2  ;;  %p5249_p11 = por %p5248_p6, %p5247_p9 }
  0xa5   : > { %p5250_p0 = pnand %p5249_p11, %p5243_p5 }
  0xa7   : > { %5253 = shalt.err (!%p5250_p0)
}
  0xa8   : > { %s5548_s17 = smov 256   ;;  %s5549_s28 = smov 16  }
  0xa9   : > { %4670 = dma.hbm_to_vmem [thread:$0]  (!%p6784_p1), %s5875_s11, 8192, %s5878_s7, %s6717_s27, %s5548_s17, %s5548_s17, %s5549_s28  }
  0xaa   : > { %s6791_s15 = sld [smem:[#allocation67_spill]]  ;;  %s783_s29 = scalar_lea.vmem [#allocation17], %s5867_s10 }
  0xab   : > { %s790_s2 = sshll.u32 %s783_s29, 4  ;;  %s5550_s6 = smov [#allocation8]   ;;  %s5912_s2 = int_to_ptr.vmem [resolvable:$true] %s790_s2 }
  0xac   : > { %s596_s13 = sshll.u32 %s5550_s6, 4  ;;  %s6792_s8 = sld [smem:[#allocation54_spill]]  ;;  %s597_s13 = int_to_ptr.vmem [resolvable:$true] %s596_s13 }
  0xad   : > { %p6793_p7 = scmp.ne.s32.totalorder %s6778_s23, 0 }
  0xaf   : > { %p6794_p10 = pneg %p6793_p7 }
  0xb0   : > { %s5909_s19 = scalar_lea.hbm %s6791_s15, %s4454_s16 }
  0xb2   : > { %s5254_s5 = scalar_lea.hbm %s6792_s8, 32 }
  0xb3   : > { %p5255_p8 = scmp.ne.s32.totalorder %s6792_s8, %s5254_s5  ;;  %p5261_p3 = scmp.lt.u32.totalorder %s5254_s5, %s6792_s8 }
  0xb5   : > { %p5257_p12 = pnand %p5255_p8, %p6794_p10 }
  0xb7   : > { %p5258_p13 = pneg %p5257_p12 }
  0xb9   : > { %p5263_p2 = pnand %p5261_p3, %p5258_p13 }
  0xbb   : > { %5266 = shalt.err (!%p5263_p2)
}
  0xbc   : > { %s5267_s6 = scalar_lea.vmem %s597_s13, 32  ;;  %p6795_p9 = pmov %p6794_p10 }
  0xbd   : > { %p5268_p5 = scmp.ne.s32.totalorder %s597_s13, %s5267_s6  ;;  %p5275_p0 = scmp.lt.s32.totalorder %s597_s13, %s597_s13 }
  0xbe   : > { %p5276_p1 = scmp.lt.s32.totalorder %s5267_s6, %s5267_s6 }
  0xbf   : > { %p5270_p6 = pnand %p5268_p5, %p6795_p9 }
  0xc0   : > { %p5277_p4 = por %p5276_p1, %p5275_p0 }
  0xc1   : > { %p5271_p11 = pneg %p5270_p6 }
  0xc3   : > { %p5278_p8 = pnand %p5277_p4, %p5271_p11 }
  0xc5   : > { %5281 = shalt.err (!%p5278_p8)
}
  0xc6   : > { %4651 = dma.hbm_to_vmem [thread:$0]  (!%p6793_p7), %s6792_s8, 32, %s597_s13, [#allocation7]  }
  0xc7   : > { %s4129_s5 = sadd.s32 4294967294, %s5540_s3   ;;  %s54_s18 = sadd.s32 1, %s5532_s24 }
  0xc8   : > { %s57_s23 = sadd.s32 1, %s5536_s25  ;;  %p55_p1 = scmp.ge.s32.totalorder %s54_s18, 2 }
  0xc9   : > { %s64_s0 = sadd.s32 1, %s5520_s22  ;;  %p71_p4 = scmp.ne.s32.totalorder %s5520_s22, %s5516_s1 }
  0xca   : > { %p77_p10 = scmp.ne.s32.totalorder %s5516_s1, %s5512_s21  ;;  %s6885_s18 = smov (%p55_p1, %s54_s18), 0 }
  0xcb   : > { %6796 = sst [smem:[#allocation41_spill]] %s6885_s18  ;;  %s6887_s23 = smov (!%p55_p1, %s57_s23), %s5536_s25 }
  0xcc   : > { %p6797_p12 = scmp.eq.s32.totalorder %s5540_s3, 0  ;;  %p6799_p13 = scmp.eq.s32.totalorder %s5716_s26, 0 }
  0xcd   : > { %p59_p2 = scmp.ge.s32.totalorder %s6887_s23, 2  ;;  %s129_s11 = ssub.s32 %s5532_s24, %s6885_s18 }
  0xce   : > { %p5947_p7 = por %p6797_p12, %p71_p4  ;;  %p5956_p3 = por %p6799_p13, %p77_p10 }
  0xcf   : > { %p130_p5 = scmp.eq.s32.totalorder %s129_s11, 0  ;;  %p6801_p9 = scmp.eq.s32.totalorder %s5716_s26, 3 }
  0xd0   : > { %s6800_s16 = scalar_select %p5956_p3, 1, 0 }
  0xd1   : > { %p5964_p6 = por %p6801_p9, %p71_p4  ;;  %s6889_s23 = smov (%p59_p2, %s6887_s23), 0 }
  0xd2   : > { %6804 = sst [smem:[#allocation43_spill]] %s6889_s23  ;;  %s6805_s28 = sadd.s32 1, %s5508_s20 }
  0xd3   : > { %s6802_s17 = scalar_select %p5964_p6, 1, 0 }
  0xd4   : > { %s5973_s4 = scalar_select %p130_p5, %s5508_s20, %s6805_s28  }
  0xd5   : > { %6803 = sst [smem:[#allocation42_spill]] %s6802_s17  ;;  %s61_s30 = ssub.s32 %s5536_s25, %s6889_s23 }
  0xd6   : > { %6806 = sst [smem:[#allocation44_spill]] %s5973_s4  ;;  %p565_p11 = scmp.eq.s32.totalorder %s4129_s5, 3 }
  0xd7   : > { %p62_p0 = scmp.eq.s32.totalorder %s61_s30, 0  ;;  %s607_s29 = sand.u32 1, %s5520_s22  }
  0xd8   : > { %p5981_p8 = por %p565_p11, %p77_p10  ;;  %s4134_s6 = sshll.u32 %s607_s29, 3 }
  0xd9   : > { %s5986_s10 = scalar_select %p62_p0, %s5520_s22, %s64_s0  }
  0xda   : > { %s6807_s7 = scalar_select %p5981_p8, 1, 0 }
  0xdb   : > { %6809 = sst [smem:[#allocation46_spill]] %s5986_s10  ;;  %s4135_s9 = sshll.u32 %s5536_s25, 7 }
  0xdc   : > { %6808 = sst [smem:[#allocation45_spill]] %s6807_s7  ;;  %s6810_s27 = sld [smem:[#allocation52_spill]] }
  0xdd   : > { %s611_s5 = scalar_lea.vmem [#allocation3], %s4134_s6  ;;  %p6811_p1 = scmp.lt.s32.totalorder %s5540_s3, 4 }
  0xde   : > { %s618_s28 = sshll.u32 %s611_s5, 4  ;;  %s608_s23 = scalar_lea.sflag [#allocation4], %s607_s29  ;;  %s6002_s28 = int_to_ptr.vmem [resolvable:$true] %s618_s28 }
  0xdf   : > { %p5998_p4 = pnand %p6811_p1, %p5947_p7 }
  0xe1   : > { %p5284_p12 = pneg %p5998_p4 }
  0xe2   : > { %s5992_s8 = scalar_lea.hbm %s6810_s27, %s4135_s9  ;;  %s6813_s9 = sld [smem:[#allocation57_spill]] }
  0xe3   : > { %s5282_s18 = scalar_lea.hbm %s5992_s8, 128  ;;  %s5287_s5 = scalar_lea.hbm %s6810_s27, 256 }
  0xe4   : > { %p5283_p10 = scmp.ne.s32.totalorder %s5992_s8, %s5282_s18  ;;  %p5288_p2 = scmp.lt.u32.totalorder %s5992_s8, %s6810_s27 }
  0xe5   : > { %p5289_p5 = scmp.lt.u32.totalorder %s5287_s5, %s5282_s18  ;;  %p5291_p11 = scmp.lt.u32.totalorder %s5282_s18, %s5992_s8 }
  0xe6   : > { %p5285_p7 = pnand %p5284_p12, %p5283_p10 }
  0xe7   : > { %p5290_p9 = por %p5289_p5, %p5288_p2 }
  0xe8   : > { %s6008_s11 = scalar_lea.hbm %s6813_s9, %s5785_s12  ;;  %p5286_p13 = pneg %p5285_p7 }
  0xe9   : > { %p5292_p0 = por %p5291_p11, %p5290_p9 }
  0xeb   : > { %p5293_p1 = pnand %p5292_p0, %p5286_p13 }
  0xed   : > { %5296 = shalt.err (!%p5293_p1)
}
  0xee   : > { %s5297_s29 = scalar_lea.vmem %s6002_s28, 128  ;;  %s5551_s0 = smov [#allocation3]  }
  0xef   : > { %p5298_p10 = scmp.ne.s32.totalorder %s6002_s28, %s5297_s29  ;;  %s5302_s14 = sshll.u32 %s5551_s0, 4  ;;  %s5303_s14 = int_to_ptr.vmem [resolvable:$false] %s5302_s14 }
  0xf0   : > { %s5304_s24 = scalar_lea.vmem %s5303_s14, 256  ;;  %p5305_p6 = scmp.lt.s32.totalorder %s6002_s28, %s5303_s14 }
  0xf1   : > { %p5300_p7 = pnand %p5298_p10, %p5284_p12  ;;  %p5306_p2 = scmp.lt.s32.totalorder %s5304_s24, %s5297_s29 }
  0xf3   : > { %p5301_p8 = pneg %p5300_p7  ;;  %p5307_p5 = por %p5306_p2, %p5305_p6 }
  0xf5   : > { %p5308_p9 = pnand %p5307_p5, %p5301_p8 }
  0xf7   : > { %5311 = shalt.err (!%p5308_p9)
}
  0xf8   : > { %s6814_s25 = sld [smem:[#allocation39_spill]]  ;;  %s6815_s18 = sld [smem:[#allocation40_spill]] }
  0xf9   : > { %4655 = dma.hbm_to_vmem [thread:$0]  (!%p5998_p4), %s5992_s8, 128, %s6002_s28, %s608_s23  }
  0xfa   : > { %s6816_s0 = sld [smem:[#allocation61_spill]]  ;;  %s5312_s30 = scalar_lea.hbm %s6008_s11, 4096 }
  0xfb   : > { %p5313_p6 = scmp.ne.s32.totalorder %s6008_s11, %s5312_s30  ;;  %s5317_s22 = scalar_lea.hbm %s6813_s9, 8192 }
  0xfc   : > { %p5318_p4 = scmp.lt.u32.totalorder %s6008_s11, %s6813_s9  ;;  %p5319_p11 = scmp.lt.u32.totalorder %s5317_s22, %s5312_s30 }
  0xfd   : > { %p5321_p1 = scmp.lt.u32.totalorder %s5312_s30, %s6008_s11 }
  0xfe   : > { %s657_s13 = scalar_lea.vmem [#allocation11], %s6814_s25  ;;  %p6818_p8 = scmp.ne.s32.totalorder %s6815_s18, 0 }
  0xff   : > { %s664_s6 = sshll.u32 %s657_s13, 4  ;;  %p5320_p0 = por %p5319_p11, %p5318_p4  ;;  %s6036_s6 = int_to_ptr.vmem [resolvable:$true] %s664_s6 }
 0x100   : > { %s6817_s14 = smov %s6816_s0  ;;  %s6042_s24 = scalar_lea.hbm %s6816_s0, %s5785_s12 }
 0x101   : > { %p5315_p12 = pnand %p5313_p6, %p6818_p8  ;;  %p5322_p10 = por %p5321_p1, %p5320_p0 }
 0x103   : > { %p5316_p13 = pneg %p5315_p12 }
 0x105   : > { %p5323_p7 = pnand %p5322_p10, %p5316_p13 }
 0x107   : > { %5326 = shalt.err (!%p5323_p7)
}
 0x108   : > { %s5327_s12 = scalar_lea.vmem %s6036_s6, 4096  ;;  %s5552_s27 = smov [#allocation11]  }
 0x109   : > { %p5328_p2 = scmp.ne.s32.totalorder %s6036_s6, %s5327_s12  ;;  %s5332_s23 = sshll.u32 %s5552_s27, 4  ;;  %s5333_s23 = int_to_ptr.vmem [resolvable:$false] %s5332_s23 }
 0x10a   : > { %s5334_s4 = scalar_lea.vmem %s5333_s23, 8192  ;;  %p5335_p6 = scmp.lt.s32.totalorder %s6036_s6, %s5333_s23 }
 0x10b   : > { %p5330_p5 = pnand %p5328_p2, %p6818_p8  ;;  %p5336_p12 = scmp.lt.s32.totalorder %s5334_s4, %s5327_s12 }
 0x10d   : > { %p5331_p9 = pneg %p5330_p5  ;;  %p5337_p4 = por %p5336_p12, %p5335_p6 }
 0x10f   : > { %p5338_p11 = pnand %p5337_p4, %p5331_p9 }
 0x111   : > { %5341 = shalt.err (!%p5338_p11)
}
 0x112   : > { %s6819_s22 = sld [smem:[#allocation37_spill]]  ;;  %s6821_s10 = smov 4  }
 0x113   : > { %s6822_s28 = smov 64   ;;  %s6823_s13 = sld [smem:[#allocation38_spill]] }
 0x114   : > { %s713_s29 = scalar_lea.vmem [#allocation14], %s6814_s25  ;;  %s5342_s30 = scalar_lea.hbm %s6042_s24, 4096 }
 0x115   : > { %s720_s0 = sshll.u32 %s713_s29, 4  ;;  %p5343_p0 = scmp.ne.s32.totalorder %s6042_s24, %s5342_s30  ;;  %s6071_s0 = int_to_ptr.vmem [resolvable:$true] %s720_s0 }
 0x116   : > { %s5347_s27 = scalar_lea.hbm %s6817_s14, 8192  ;;  %p5348_p7 = scmp.lt.u32.totalorder %s6042_s24, %s6817_s14 }
 0x117   : > { %p5345_p1 = pnand %p5343_p0, %p6818_p8  ;;  %p5349_p2 = scmp.lt.u32.totalorder %s5347_s27, %s5342_s30 }
 0x118   : > { %p6820_p13 = scmp.ne.s32.totalorder %s6819_s22, 0  ;;  %p5351_p9 = scmp.lt.u32.totalorder %s5342_s30, %s6042_s24 }
 0x119   : > { %s6824_s5 = scalar_lea.sflag [#allocation10], %s6823_s13  ;;  %p5346_p10 = pneg %p5345_p1 }
 0x11a   : > { %4661 = dma.hbm_to_vmem [thread:$0]  (!%p6820_p13), %s6008_s11, 4096, %s6036_s6, %s6824_s5, %s6822_s28, %s6822_s28, %s6821_s10  }
 0x11b   : > { %p5350_p5 = por %p5349_p2, %p5348_p7 }
 0x11d   : > { %p5352_p6 = por %p5351_p9, %p5350_p5 }
 0x11f   : > { %p5353_p12 = pnand %p5352_p6, %p5346_p10 }
 0x121   : > { %5356 = shalt.err (!%p5353_p12)
}
 0x122   : > { %s5357_s11 = scalar_lea.vmem %s6071_s0, 4096  ;;  %s5553_s25 = smov [#allocation14]  }
 0x123   : > { %p5358_p4 = scmp.ne.s32.totalorder %s6071_s0, %s5357_s11  ;;  %s5362_s6 = sshll.u32 %s5553_s25, 4  ;;  %s5363_s6 = int_to_ptr.vmem [resolvable:$false] %s5362_s6 }
 0x124   : > { %s5364_s10 = scalar_lea.vmem %s5363_s6, 8192  ;;  %p5365_p1 = scmp.lt.s32.totalorder %s6071_s0, %s5363_s6 }
 0x125   : > { %p5360_p11 = pnand %p5358_p4, %p6818_p8  ;;  %p5366_p3 = scmp.lt.s32.totalorder %s5364_s10, %s5357_s11 }
 0x127   : > { %p5361_p0 = pneg %p5360_p11  ;;  %p5367_p7 = por %p5366_p3, %p5365_p1 }
 0x129   : > { %p5368_p2 = pnand %p5367_p7, %p5361_p0 }
 0x12b   : > { %5371 = shalt.err (!%p5368_p2)
}
 0x12c   : > { %s5554_s28 = smov 128   ;;  %s5555_s5 = smov 8  }
 0x12d   : > { %s6825_s29 = scalar_lea.sflag [#allocation13], %s6823_s13  ;;  %s5372_s30 = scalar_lea.hbm %s5909_s19, 8192 }
 0x12e   : > { %4667 = dma.hbm_to_vmem [thread:$0]  (!%p6820_p13), %s6042_s24, 4096, %s6071_s0, %s6825_s29, %s5554_s28, %s5554_s28, %s5555_s5  }
 0x12f   : > { %p5373_p3 = scmp.ne.s32.totalorder %s5909_s19, %s5372_s30  ;;  %s5377_s27 = scalar_lea.hbm %s6791_s15, 16384 }
 0x130   : > { %p5378_p9 = scmp.lt.u32.totalorder %s5909_s19, %s6791_s15  ;;  %p5379_p6 = scmp.lt.u32.totalorder %s5377_s27, %s5372_s30 }
 0x131   : > { %p5375_p10 = pnand %p5373_p3, %p6818_p8  ;;  %p5381_p4 = scmp.lt.u32.totalorder %s5372_s30, %s5909_s19 }
 0x132   : > { %p5380_p12 = por %p5379_p6, %p5378_p9 }
 0x133   : > { %p5376_p5 = pneg %p5375_p10 }
 0x134   : > { %p5382_p11 = por %p5381_p4, %p5380_p12 }
 0x136   : > { %p5383_p0 = pnand %p5382_p11, %p5376_p5 }
 0x138   : > { %5386 = shalt.err (!%p5383_p0)
}
 0x139   : > { %s5387_s24 = scalar_lea.vmem %s5912_s2, 8192  ;;  %s5556_s0 = smov [#allocation17]  }
 0x13a   : > { %p5388_p1 = scmp.ne.s32.totalorder %s5912_s2, %s5387_s24  ;;  %s5392_s11 = sshll.u32 %s5556_s0, 4  ;;  %s5393_s11 = int_to_ptr.vmem [resolvable:$false] %s5392_s11 }
 0x13b   : > { %s5394_s25 = scalar_lea.vmem %s5393_s11, 16384  ;;  %p5395_p3 = scmp.lt.s32.totalorder %s5912_s2, %s5393_s11 }
 0x13c   : > { %p5390_p7 = pnand %p5388_p1, %p6818_p8  ;;  %p5396_p10 = scmp.lt.s32.totalorder %s5394_s25, %s5387_s24 }
 0x13e   : > { %p5391_p2 = pneg %p5390_p7  ;;  %p5397_p9 = por %p5396_p10, %p5395_p3 }
 0x140   : > { %p5398_p6 = pnand %p5397_p9, %p5391_p2 }
 0x142   : > { %5401 = shalt.err (!%p5398_p6)
}
 0x143   : > { %s6826_s6 = scalar_lea.sflag [#allocation16], %s6823_s13  ;;  %s6827_s18 = sld [smem:[#allocation36_spill]] }
 0x144   : > { %4673 = dma.hbm_to_vmem [thread:$0]  (!%p6820_p13), %s5909_s19, 8192, %s5912_s2, %s6826_s6, %s5554_s28, %s5554_s28, %s5555_s5  }
 0x149   : > { %p6828_p8 = scmp.ne.s32.totalorder %s6827_s18, 0 }
 0x14b   : > { %823 = sbr.rel (%p6828_p8) target bundleno = 2954 (0xb8a), region = 96 }
 0x152   : > { %s6128_s10 = sand.u32 1, %s5516_s1   ;;  %p6830_p5 = scmp.ne.s32.totalorder %s6800_s16, 0 }
 0x153   : > { %6829 = sst [smem:[#allocation47_spill]] %s6128_s10  ;;  %s4155_s29 = sshll.u32 %s6128_s10, 3 }
 0x154   : > { %s826_s30 = scalar_lea.sflag [#allocation4], %s6128_s10  ;;  %s6132_s22 = scalar_lea.vmem [#allocation3], %s4155_s29 }
 0x155   : > { %5475 = dma.done.wait (%p6830_p5), %s826_s30, 128  }
 0x156   : > { %5477 = vsyncadd (%p6830_p5), %s826_s30, 4294967168  ;;  %p6831_p13 = scmp.eq.s32.totalorder %s5716_s26, 0 }
 0x158   : > { %5479 = dma.done.wait (%p6831_p13), [#allocation7], 160   ;;  %p6832_p12 = pmov %p6831_p13 }
 0x159   : > { %s6833_s19 = sld [smem:[#allocation25_spill]]  ;;  %s6834_s2 = sld [smem:[#allocation35_spill]] }
 0x15a   : > { %5481 = vsyncadd (%p6832_p12), [#allocation7], 4294967136  ;;  %s842_s13 = sand.u32 1, %s5716_s26  }
 0x15b   : > { %s843_s8 = scalar_lea.sflag [#allocation10], %s842_s13 }
 0x15f   : > { %s844_s28 = sand.u32 1, %s6833_s19   ;;  %p6835_p4 = scmp.ne.s32.totalorder %s6834_s2, 0 }
 0x160   : > { %s4158_s5 = sshll.u32 %s844_s28, 8 }
 0x161   : > { %s6144_s12 = scalar_lea.vmem [#allocation9], %s4158_s5 }
 0x162   : > { %5483 = dma.done.wait (%p6835_p4), %s843_s8, 8192  }
 0x163   : > { %5485 = vsyncadd (%p6835_p4), %s843_s8, 4294959104  ;;  %s6150_s16 = scalar_lea.vmem [#allocation11], %s4158_s5  ;;  %s861_s27 = scalar_lea.sflag [#allocation13], %s842_s13 }
 0x164   : > { %s6152_s23 = scalar_lea.vmem [#allocation12], %s4158_s5 }
 0x165   : > { %5487 = dma.done.wait (%p6835_p4), %s861_s27, 8192  }
 0x166   : > { %5489 = vsyncadd (%p6835_p4), %s861_s27, 4294959104  ;;  %s4162_s26 = sshll.u32 %s844_s28, 9  ;;  %s6158_s4 = scalar_lea.vmem [#allocation14], %s4158_s5 }
 0x167   : > { %6836 = sst [smem:[#allocation48_spill]] %s6158_s4  ;;  %s879_s24 = scalar_lea.sflag [#allocation16], %s842_s13 }
 0x168   : > { %s6160_s0 = scalar_lea.vmem [#allocation15], %s4162_s26 }
 0x169   : > { %6837 = sst [smem:[#allocation49_spill]] %s6160_s0 }
 0x16a   : > { %5491 = dma.done.wait (%p6835_p4), %s879_s24, 16384  }
 0x16b   : > { %5493 = vsyncadd (%p6835_p4), %s879_s24, 4294950912  ;;  %s6838_s11 = sld [smem:[#allocation30_spill]]  ;;  %s4164_s25 = sshll.u32 %s6128_s10, 4 }
 0x16c   : > { %s6839_s2 = sld [smem:[#allocation56_spill]]  ;;  %s6841_s8 = sld [smem:[#allocation58_spill]] }
 0x16d   : > { %s6842_s14 = sld [smem:[#allocation60_spill]]  ;;  %s6846_s10 = sld [smem:[#allocation64_spill]] }
 0x16e   : > { %s6848_s24 = sld [smem:[#allocation68_spill]]  ;;  %s6849_s1 = sld [smem:[#allocation69_spill]] }
 0x16f   : > { %s6850_s17 = sld [smem:[#allocation70_spill]]  ;;  %s6218_s30 = scalar_lea.vmem [#allocation17], %s4162_s26 }
 0x171   : > { %p1016_p11 = scmp.lt.s32.totalorder %s6838_s11, 1  ;;  %p4175_p0 = scmp.ne.s32.totalorder %s6838_s11, 0 }
 0x172   : > { %v1063_v0 = vld [vmem:[#allocation6] sm:$0xff] (!%p4175_p0)  ;;  %vm1085_vm0 = vcmask (!%p4175_p0), 1043456   ;;  %v1061_v1 = vld [vmem:[%s6132_s22] sm:$0xff] (!%p4175_p0)  ;;  %v5557_v4 = vmov (!%p4175_p0), 0   ;;  %vm1081_vm1 = vcmask (!%p4175_p0), 64512   ;;  %v1066_v7 = vlaneseq (!%p4175_p0) }
 0x173   : > { %s1017_s6 = scalar_select %p1016_p11, %s6838_s11, 1 }
 0x174   : > { %v4177_v2 = vcombine.high (!%p4175_p0), %v1063_v0, %v1063_v0  ;;  %v4176_v3 = vcombine.low (!%p4175_p0), %v1063_v0, %v1063_v0  ;;  %1124 = vmatprep.mubr.bf16.mxu0 (!%p4175_p0), %v5557_v4  ;;  %v1062_v6 = vpack.c.bf16 (!%p4175_p0), %v1061_v1, %v1061_v1  ;;  %v1067_v8 = vshrl.u32 (!%p4175_p0), %v1066_v7, 7  ;;  %v1064_v10 = vld [vmem:[#allocation8] sm:$0x3] (!%p4175_p0) }
 0x175   : > { %s6169_s18 = sshll.u32 %s1017_s6, 1  ;;  %s4171_s29 = sshll.u32 %s1017_s6, 2 }
 0x176   : > { %s6175_s13 = scalar_lea.vmem %s6839_s2, %s6169_s18  ;;  %s6181_s27 = scalar_lea.vmem %s6841_s8, %s6169_s18  ;;  %4178 = vmatprep.subr.msk.bf16.mxu0 (!%p4175_p0), %vm1085_vm0, %v4177_v2  ;;  %v1087_v5 = vsel (!%p4175_p0), %vm1085_vm0, %v4176_v3, 0  ;;  %v1068_v9 = vsub.s32 (!%p4175_p0), 0, %v1067_v8  ;;  %v1072_v11 = vsub.s32 (!%p4175_p0), 1, %v1067_v8 }
 0x177   : > { %6840 = sst [smem:[#allocation50_spill]] %s6175_s13  ;;  %s6187_s15 = scalar_lea.vmem %s6842_s14, %s6169_s18  ;;  %1093 = vmatpush1.bf16.msra.mxu0 (!%p4175_p0), %v1087_v5 }
 0x178   : > { %6843 = sst [smem:[#allocation51_spill]] %s6187_s15  ;;  %s1039_s0 = scalar_lea.vmem %s6846_s10, %s6169_s18  ;;  %v1069_v12 = vrot.slane (!%p4175_p0), %v1064_v10, %v1068_v9  ;;  %v1073_v13 = vrot.slane (!%p4175_p0), %v1064_v10, %v1072_v11 }
 0x179   : > { %s6847_s8 = sld [smem:[#allocation66_spill]]  ;;  %s1047_s15 = scalar_lea.vmem %s6848_s24, %s6169_s18 }
 0x17a   : > { %s1051_s7 = scalar_lea.vmem %s6849_s1, %s6169_s18  ;;  %s1055_s6 = scalar_lea.vmem %s6850_s17, %s6169_s18  ;;  %4179 = vmatmul.mubr.msk.bf16.vlgmr.msra.gmra.mrb[0].mxu0 (!%p4175_p0), %vm1081_vm1, %v1062_v6 }
 0x17b   : > { %s6220_s10 = scalar_lea.vmem [#allocation18], %s4164_s25  ;;  %1060 = sbr.rel (%p4175_p0) target bundleno = 594 (0x252), region = 136 }
 0x17f   : > { %s6204_s4 = scalar_lea.vmem %s6847_s8, %s4171_s29 }
 0x24d   : > { %v1126_v14 = vpop.f32.mrb[0].mxu0 }
 0x24e   : > { %v1127_v15 = vadd.f32 %v1126_v14, %v1069_v12  ;;  %v1128_v16 = vpop.f32.mrb[1].mxu0 }
 0x24f   : > { %v1129_v17 = vadd.f32 %v1128_v16, %v1073_v13  ;;  %v1130_v18 = vpop.f32.mrb[2].mxu0 }
 0x250   : > { %1133 = vst [vmem:[#allocation2] sm:$0xff] %v1127_v15  ;;  %v1131_v19 = vpop.f32.mrb[3].mxu0 }
 0x251   : > { %1134 = vst [vmem:[#allocation2 + $0x8] sm:$0xff] %v1129_v17 }
 0x252 PF: > { %v4786_v20 = vld [vmem:[%s6144_s12 + $0x40] sm:$0xff]   ;;  %v4790_v24 = vld [vmem:[%s6144_s12 + $0x48] sm:$0xff]   ;;  %v4794_v28 = vld [vmem:[%s6144_s12 + $0x50] sm:$0xff]   ;;  %vm5559_vm2 = vmmov 0   ;;  %s6851_s21 = sld [smem:[#allocation50_spill]]  ;;  %s6852_s22 = sld [smem:[#allocation51_spill]] }
 0x253   : > { %v4787_v21 = vld [vmem:[%s6144_s12 + $0xc0] sm:$0xff]   ;;  %4457 = vmatprep.subr.bf16.mxu0 %v4786_v20  ;;  %v4791_v25 = vld [vmem:[%s6144_s12 + $0xc8] sm:$0xff]   ;;  %v4795_v29 = vld [vmem:[%s6144_s12 + $0xd0] sm:$0xff]   ;;  %vm2305_vm3 = vcmask 1043456   ;;  %vm2277_vm4 = vcmask 64512   ;;  %s6854_s26 = sld [smem:[#allocation62_spill]] }
 0x254   : > { %v4788_v22 = vld [vmem:[%s6144_s12] sm:$0xff]   ;;  %4479 = vmatprep.subr.bf16.mxu1 %v4787_v21  ;;  %v4792_v26 = vld [vmem:[%s6144_s12 + $0x8] sm:$0xff]   ;;  %v4796_v30 = vld [vmem:[%s6144_s12 + $0x10] sm:$0xff]   ;;  %s6856_s25 = sld [smem:[#allocation49_spill]]  ;;  %s6863_s1 = sld [smem:[#allocation30_spill]] }
 0x255   : > { %v4789_v23 = vld [vmem:[%s6144_s12 + $0x80] sm:$0xff]   ;;  %4458 = vmatpush3.bf16.msra.mxu0 %v4788_v22  ;;  %v4793_v27 = vld [vmem:[%s6144_s12 + $0x88] sm:$0xff]   ;;  %v4797_v31 = vld [vmem:[%s6144_s12 + $0x90] sm:$0xff]  }
 0x256   : > { %4480 = vmatpush3.bf16.msra.mxu1 %v4789_v23  ;;  %4459 = vmatprep.subr.bf16.mxu0 %v4790_v24  ;;  %v4798_v32 = vld [vmem:[%s6144_s12 + $0x58] sm:$0xff]   ;;  %v4802_v36 = vld [vmem:[%s6144_s12 + $0x60] sm:$0xff]   ;;  %v4806_v40 = vld [vmem:[%s6144_s12 + $0x68] sm:$0xff]  }
 0x257   : > { %4481 = vmatprep.subr.bf16.mxu1 %v4791_v25  ;;  %v4799_v33 = vld [vmem:[%s6144_s12 + $0xd8] sm:$0xff]   ;;  %v4803_v37 = vld [vmem:[%s6144_s12 + $0xe0] sm:$0xff]   ;;  %v4807_v41 = vld [vmem:[%s6144_s12 + $0xe8] sm:$0xff]  }
 0x258   : > { %v4800_v34 = vld [vmem:[%s6144_s12 + $0x18] sm:$0xff]   ;;  %v4804_v38 = vld [vmem:[%s6144_s12 + $0x20] sm:$0xff]   ;;  %v4808_v42 = vld [vmem:[%s6144_s12 + $0x28] sm:$0xff]  }
 0x259   : > { %4460 = vmatpush3.bf16.msra.mxu0 %v4792_v26  ;;  %v4801_v35 = vld [vmem:[%s6144_s12 + $0x98] sm:$0xff]   ;;  %v4805_v39 = vld [vmem:[%s6144_s12 + $0xa0] sm:$0xff]   ;;  %v4809_v43 = vld [vmem:[%s6144_s12 + $0xa8] sm:$0xff]   ;;  %s6855_s11 = scalar_lea.vmem %s6854_s26, %s6169_s18 }
 0x25a   : > { %4482 = vmatpush3.bf16.msra.mxu1 %v4793_v27  ;;  %4461 = vmatprep.subr.bf16.mxu0 %v4794_v28  ;;  %v4810_v44 = vld [vmem:[%s6144_s12 + $0x70] sm:$0xff]   ;;  %v4814_v48 = vld [vmem:[%s6144_s12 + $0x78] sm:$0xff]   ;;  %v4818_v56 = vld [vmem:[%s6150_s16 + $0x40] sm:$0xff]   ;;  %p4444_p1 = scmp.ne.s32.totalorder %s6863_s1, 1 }
 0x25b   : > { %4483 = vmatprep.subr.bf16.mxu1 %v4795_v29  ;;  %v4811_v45 = vld [vmem:[%s6144_s12 + $0xf0] sm:$0xff]   ;;  %v4815_v49 = vld [vmem:[%s6144_s12 + $0xf8] sm:$0xff]   ;;  %v4819_v57 = vld [vmem:[%s6150_s16 + $0xc0] sm:$0xff]  }
 0x25c   : > { %v4812_v46 = vld [vmem:[%s6144_s12 + $0x30] sm:$0xff]   ;;  %v4816_v50 = vld [vmem:[%s6144_s12 + $0x38] sm:$0xff]   ;;  %v4820_v58 = vld [vmem:[%s6150_s16] sm:$0xff]  }
 0x25d   : > { %4462 = vmatpush3.bf16.msra.mxu0 %v4796_v30  ;;  %v4813_v47 = vld [vmem:[%s6144_s12 + $0xb0] sm:$0xff]   ;;  %v4817_v51 = vld [vmem:[%s6144_s12 + $0xb8] sm:$0xff]   ;;  %v4821_v59 = vld [vmem:[%s6150_s16 + $0x80] sm:$0xff]   ;;  %s6853_s12 = sld [smem:[#allocation48_spill]] }
 0x25e   : > { %4484 = vmatpush3.bf16.msra.mxu1 %v4797_v31  ;;  %4463 = vmatprep.subr.bf16.mxu0 %v4798_v32  ;;  %v1136_v52 = vld [vmem:[#allocation2 + $0x8] sm:$0xff]  ;;  %v1135_v53 = vld [vmem:[#allocation2] sm:$0xff]  ;;  %v4822_v60 = vld [vmem:[%s6150_s16 + $0x48] sm:$0xff]  }
 0x25f   : > { %4485 = vmatprep.subr.bf16.mxu1 %v4799_v33  ;;  %v6256_v54 = vpack.c.bf16 %v1136_v52, %v1136_v52  ;;  %v6258_v55 = vpack.c.bf16 %v1135_v53, %v1135_v53  ;;  %v4823_v61 = vld [vmem:[%s6150_s16 + $0xc8] sm:$0xff]   ;;  %v4826_v0 = vld [vmem:[%s6150_s16 + $0x50] sm:$0xff]   ;;  %v4830_v4 = vld [vmem:[%s6150_s16 + $0x58] sm:$0xff]  }
 0x260   : > { %v4824_v62 = vld [vmem:[%s6150_s16 + $0x8] sm:$0xff]   ;;  %v4827_v1 = vld [vmem:[%s6150_s16 + $0xd0] sm:$0xff]   ;;  %v4831_v5 = vld [vmem:[%s6150_s16 + $0xd8] sm:$0xff]  }
 0x261   : > { %4464 = vmatpush3.bf16.msra.mxu0 %v4800_v34  ;;  %1345 = vmatprep.mubr.bf16.mxu0 %v6256_v54  ;;  %v4825_v63 = vld [vmem:[%s6150_s16 + $0x88] sm:$0xff]   ;;  %v4828_v2 = vld [vmem:[%s6150_s16 + $0x10] sm:$0xff]   ;;  %v4832_v6 = vld [vmem:[%s6150_s16 + $0x18] sm:$0xff]  }
 0x262   : > { %4486 = vmatpush3.bf16.msra.mxu1 %v4801_v35  ;;  %4465 = vmatprep.subr.bf16.mxu0 %v4802_v36  ;;  %v4829_v3 = vld [vmem:[%s6150_s16 + $0x90] sm:$0xff]   ;;  %v4833_v7 = vld [vmem:[%s6150_s16 + $0x98] sm:$0xff]   ;;  %v4834_v8 = vld [vmem:[%s6150_s16 + $0x60] sm:$0xff]  }
 0x263   : > { %4487 = vmatprep.subr.bf16.mxu1 %v4803_v37  ;;  %1481 = vmatprep.mubr.bf16.mxu1 %v6256_v54  ;;  %v4835_v9 = vld [vmem:[%s6150_s16 + $0xe0] sm:$0xff]   ;;  %v4838_v12 = vld [vmem:[%s6150_s16 + $0x68] sm:$0xff]   ;;  %v4842_v16 = vld [vmem:[%s6150_s16 + $0x70] sm:$0xff]  }
 0x264   : > { %v4836_v10 = vld [vmem:[%s6150_s16 + $0x20] sm:$0xff]   ;;  %v4839_v13 = vld [vmem:[%s6150_s16 + $0xe8] sm:$0xff]   ;;  %v4843_v17 = vld [vmem:[%s6150_s16 + $0xf0] sm:$0xff]  }
 0x265   : > { %4466 = vmatpush3.bf16.msra.mxu0 %v4804_v38  ;;  %v4837_v11 = vld [vmem:[%s6150_s16 + $0xa0] sm:$0xff]   ;;  %v4840_v14 = vld [vmem:[%s6150_s16 + $0x28] sm:$0xff]   ;;  %v4844_v18 = vld [vmem:[%s6150_s16 + $0x30] sm:$0xff]  }
 0x266   : > { %4488 = vmatpush3.bf16.msra.mxu1 %v4805_v39  ;;  %4467 = vmatprep.subr.bf16.mxu0 %v4806_v40  ;;  %v4841_v15 = vld [vmem:[%s6150_s16 + $0xa8] sm:$0xff]   ;;  %v4845_v19 = vld [vmem:[%s6150_s16 + $0xb0] sm:$0xff]   ;;  %v4846_v20 = vld [vmem:[%s6150_s16 + $0x78] sm:$0xff]  }
 0x267   : > { %4489 = vmatprep.subr.bf16.mxu1 %v4807_v41  ;;  %v4847_v21 = vld [vmem:[%s6150_s16 + $0xf8] sm:$0xff]   ;;  %v4850_v24 = vld [vmem:[%s6152_s23 + $0x40] sm:$0xff]   ;;  %v4854_v28 = vld [vmem:[%s6152_s23 + $0x48] sm:$0xff]  }
 0x268   : > { %v4848_v22 = vld [vmem:[%s6150_s16 + $0x38] sm:$0xff]   ;;  %v4851_v25 = vld [vmem:[%s6152_s23 + $0xc0] sm:$0xff]   ;;  %v4855_v29 = vld [vmem:[%s6152_s23 + $0xc8] sm:$0xff]  }
 0x269   : > { %4468 = vmatpush3.bf16.msra.mxu0 %v4808_v42  ;;  %v4849_v23 = vld [vmem:[%s6150_s16 + $0xb8] sm:$0xff]   ;;  %v4852_v26 = vld [vmem:[%s6152_s23] sm:$0xff]   ;;  %v4856_v30 = vld [vmem:[%s6152_s23 + $0x8] sm:$0xff]  }
 0x26a   : > { %4490 = vmatpush3.bf16.msra.mxu1 %v4809_v43  ;;  %4469 = vmatprep.subr.bf16.mxu0 %v4810_v44  ;;  %v4853_v27 = vld [vmem:[%s6152_s23 + $0x80] sm:$0xff]   ;;  %v4857_v31 = vld [vmem:[%s6152_s23 + $0x88] sm:$0xff]   ;;  %v4858_v32 = vld [vmem:[%s6152_s23 + $0x50] sm:$0xff]  }
 0x26b   : > { %4491 = vmatprep.subr.bf16.mxu1 %v4811_v45  ;;  %v4859_v33 = vld [vmem:[%s6152_s23 + $0xd0] sm:$0xff]   ;;  %v4862_v36 = vld [vmem:[%s6152_s23 + $0x58] sm:$0xff]   ;;  %v4866_v40 = vld [vmem:[%s6152_s23 + $0x60] sm:$0xff]  }
 0x26c   : > { %v4860_v34 = vld [vmem:[%s6152_s23 + $0x10] sm:$0xff]   ;;  %v4863_v37 = vld [vmem:[%s6152_s23 + $0xd8] sm:$0xff]   ;;  %v4867_v41 = vld [vmem:[%s6152_s23 + $0xe0] sm:$0xff]  }
 0x26d   : > { %4470 = vmatpush3.bf16.msra.mxu0 %v4812_v46  ;;  %v4861_v35 = vld [vmem:[%s6152_s23 + $0x90] sm:$0xff]   ;;  %v4864_v38 = vld [vmem:[%s6152_s23 + $0x18] sm:$0xff]   ;;  %v4868_v42 = vld [vmem:[%s6152_s23 + $0x20] sm:$0xff]  }
 0x26e   : > { %4492 = vmatpush3.bf16.msra.mxu1 %v4813_v47  ;;  %4471 = vmatprep.subr.bf16.mxu0 %v4814_v48  ;;  %v4865_v39 = vld [vmem:[%s6152_s23 + $0x98] sm:$0xff]   ;;  %v4869_v43 = vld [vmem:[%s6152_s23 + $0xa0] sm:$0xff]   ;;  %v4870_v44 = vld [vmem:[%s6152_s23 + $0x68] sm:$0xff]  }
 0x26f   : > { %4493 = vmatprep.subr.bf16.mxu1 %v4815_v49  ;;  %v4871_v45 = vld [vmem:[%s6152_s23 + $0xe8] sm:$0xff]   ;;  %v4874_v48 = vld [vmem:[%s6152_s23 + $0x70] sm:$0xff]   ;;  %v4878_v52 = vld [vmem:[%s6152_s23 + $0x78] sm:$0xff]  }
 0x270   : > { %v4872_v46 = vld [vmem:[%s6152_s23 + $0x28] sm:$0xff]   ;;  %v4875_v49 = vld [vmem:[%s6152_s23 + $0xf0] sm:$0xff]   ;;  %v4879_v53 = vld [vmem:[%s6152_s23 + $0xf8] sm:$0xff]  }
 0x271   : > { %4472 = vmatpush3.bf16.msra.mxu0 %v4816_v50  ;;  %v4873_v47 = vld [vmem:[%s6152_s23 + $0xa8] sm:$0xff]   ;;  %v4876_v50 = vld [vmem:[%s6152_s23 + $0x30] sm:$0xff]  }
 0x272   : > { %4494 = vmatpush3.bf16.msra.mxu1 %v4817_v51  ;;  %4501 = vmatprep.subr.bf16.mxu0 %v4818_v56  ;;  %v4877_v51 = vld [vmem:[%s6152_s23 + $0xb0] sm:$0xff]   ;;  %v4881_v56 = vld [vmem:[%s6152_s23 + $0xb8] sm:$0xff]  }
 0x273   : > { %4523 = vmatprep.subr.bf16.mxu1 %v4819_v57  ;;  %v5558_v57 = vmov 0.0  }
 0x274   : > { %1346 = vmatmul.mubr.bf16.vlgmr.msra.gmra.mrb[0].mxu0 %v6258_v55 }
 0x275   : > { %1482 = vmatmul.mubr.bf16.vlgmr.msra.gmra.mrb[0].mxu1 %v6258_v55  ;;  %4502 = vmatpush3.bf16.msra.mxu0 %v4820_v58 }
 0x276   : > { %4524 = vmatpush3.bf16.msra.mxu1 %v4821_v59  ;;  %4503 = vmatprep.subr.bf16.mxu0 %v4822_v60 }
 0x277   : > { %1695 = vmatprep.mubr.bf16.mxu0 %v6256_v54  ;;  %4525 = vmatprep.subr.bf16.mxu1 %v4823_v61 }
 0x278   : > { %1831 = vmatprep.mubr.bf16.mxu1 %v6256_v54 }
 0x279   : > { %4504 = vmatpush3.bf16.msra.mxu0 %v4824_v62 }
 0x27a   : > { %4526 = vmatpush3.bf16.msra.mxu1 %v4825_v63  ;;  %4505 = vmatprep.subr.bf16.mxu0 %v4826_v0 }
 0x27b   : > { %4527 = vmatprep.subr.bf16.mxu1 %v4827_v1 }
 0x27d   : > { %4506 = vmatpush3.bf16.msra.mxu0 %v4828_v2 }
 0x27e   : > { %4528 = vmatpush3.bf16.msra.mxu1 %v4829_v3  ;;  %4507 = vmatprep.subr.bf16.mxu0 %v4830_v4 }
 0x27f   : > { %4529 = vmatprep.subr.bf16.mxu1 %v4831_v5  ;;  %v4214_v5 = vld [vmem:[%s6181_s27] ss:$0 sm:$0xff] }
 0x281   : > { %4508 = vmatpush3.bf16.msra.mxu0 %v4832_v6 }
 0x282   : > { %4530 = vmatpush3.bf16.msra.mxu1 %v4833_v7  ;;  %4509 = vmatprep.subr.bf16.mxu0 %v4834_v8  ;;  %v4215_v7 = vld [vmem:[%s6181_s27 + $0x1] ss:$0 sm:$0xff]  ;;  %s6857_s27 = sld [smem:[#allocation63_spill]] }
 0x283   : > { %4531 = vmatprep.subr.bf16.mxu1 %v4835_v9  ;;  %v4180_v9 = vld [vmem:[%s6851_s21] ss:$0 sm:$0xff] }
 0x285   : > { %4510 = vmatpush3.bf16.msra.mxu0 %v4836_v10  ;;  %v4181_v10 = vld [vmem:[%s6851_s21 + $0x1] ss:$0 sm:$0xff] }
 0x286   : > { %4532 = vmatpush3.bf16.msra.mxu1 %v4837_v11  ;;  %4511 = vmatprep.subr.bf16.mxu0 %v4838_v12 }
 0x287   : > { %4533 = vmatprep.subr.bf16.mxu1 %v4839_v13 }
 0x288   : > { %s6858_s19 = scalar_lea.vmem %s6857_s27, %s6169_s18 }
 0x289   : > { %4512 = vmatpush3.bf16.msra.mxu0 %v4840_v14 }
 0x28a   : > { %4534 = vmatpush3.bf16.msra.mxu1 %v4841_v15  ;;  %4513 = vmatprep.subr.bf16.mxu0 %v4842_v16 }
 0x28b   : > { %4535 = vmatprep.subr.bf16.mxu1 %v4843_v17 }
 0x28d   : > { %4514 = vmatpush3.bf16.msra.mxu0 %v4844_v18 }
 0x28e   : > { %4536 = vmatpush3.bf16.msra.mxu1 %v4845_v19  ;;  %4515 = vmatprep.subr.bf16.mxu0 %v4846_v20 }
 0x28f   : > { %4537 = vmatprep.subr.bf16.mxu1 %v4847_v21 }
 0x291   : > { %4516 = vmatpush3.bf16.msra.mxu0 %v4848_v22 }
 0x292   : > { %4538 = vmatpush3.bf16.msra.mxu1 %v4849_v23  ;;  %4545 = vmatprep.subr.bf16.mxu0 %v4850_v24 }
 0x293   : > { %4567 = vmatprep.subr.bf16.mxu1 %v4851_v25 }
 0x294   : > { %1696 = vmatmul.mubr.bf16.vlgmr.msra.gmra.mrb[4].mxu0 %v6258_v55 }
 0x295   : > { %1832 = vmatmul.mubr.bf16.vlgmr.msra.gmra.mrb[4].mxu1 %v6258_v55  ;;  %2045 = vmatprep.mubr.bf16.mxu0 %v6256_v54 }
 0x296   : > { %2181 = vmatprep.mubr.bf16.mxu1 %v6256_v54  ;;  %4546 = vmatpush3.bf16.msra.mxu0 %v4852_v26  ;;  %v4880_v54 = vld [vmem:[%s6152_s23 + $0x38] sm:$0xff]  }
 0x297   : > { %4568 = vmatpush3.bf16.msra.mxu1 %v4853_v27  ;;  %4547 = vmatprep.subr.bf16.mxu0 %v4854_v28 }
 0x298   : > { %4569 = vmatprep.subr.bf16.mxu1 %v4855_v29  ;;  %v4248_v29 = vld [vmem:[%s6852_s22] ss:$0 sm:$0xff] }
 0x29a   : > { %4548 = vmatpush3.bf16.msra.mxu0 %v4856_v30 }
 0x29b   : > { %4570 = vmatpush3.bf16.msra.mxu1 %v4857_v31  ;;  %4549 = vmatprep.subr.bf16.mxu0 %v4858_v32 }
 0x29c   : > { %4571 = vmatprep.subr.bf16.mxu1 %v4859_v33 }
 0x29e   : > { %4550 = vmatpush3.bf16.msra.mxu0 %v4860_v34 }
 0x29f   : > { %4572 = vmatpush3.bf16.msra.mxu1 %v4861_v35  ;;  %4551 = vmatprep.subr.bf16.mxu0 %v4862_v36 }
 0x2a0   : > { %4573 = vmatprep.subr.bf16.mxu1 %v4863_v37 }
 0x2a2   : > { %4552 = vmatpush3.bf16.msra.mxu0 %v4864_v38 }
 0x2a3   : > { %4574 = vmatpush3.bf16.msra.mxu1 %v4865_v39  ;;  %4553 = vmatprep.subr.bf16.mxu0 %v4866_v40  ;;  %v4249_v39 = vld [vmem:[%s6852_s22 + $0x1] ss:$0 sm:$0xff] }
 0x2a4   : > { %4575 = vmatprep.subr.bf16.mxu1 %v4867_v41 }
 0x2a6   : > { %4554 = vmatpush3.bf16.msra.mxu0 %v4868_v42 }
 0x2a7   : > { %4576 = vmatpush3.bf16.msra.mxu1 %v4869_v43  ;;  %4555 = vmatprep.subr.bf16.mxu0 %v4870_v44 }
 0x2a8   : > { %4577 = vmatprep.subr.bf16.mxu1 %v4871_v45 }
 0x2aa   : > { %4556 = vmatpush3.bf16.msra.mxu0 %v4872_v46 }
 0x2ab   : > { %4578 = vmatpush3.bf16.msra.mxu1 %v4873_v47  ;;  %4557 = vmatprep.subr.bf16.mxu0 %v4874_v48 }
 0x2ac   : > { %4579 = vmatprep.subr.bf16.mxu1 %v4875_v49 }
 0x2ae   : > { %4558 = vmatpush3.bf16.msra.mxu0 %v4876_v50 }
 0x2af   : > { %4580 = vmatpush3.bf16.msra.mxu1 %v4877_v51  ;;  %4559 = vmatprep.subr.bf16.mxu0 %v4878_v52 }
 0x2b0   : > { %4581 = vmatprep.subr.bf16.mxu1 %v4879_v53 }
 0x2b2   : > { %4560 = vmatpush3.bf16.msra.mxu0 %v4880_v54 }
 0x2b3   : > { %4582 = vmatpush3.bf16.msra.mxu1 %v4881_v56  ;;  %4597 = vmatprep.subr.bf16.mxu0 %v5558_v57 }
 0x2b4   : > { %4603 = vmatprep.subr.bf16.mxu1 %v5558_v57 }
 0x2b5   : > { %2046 = vmatmul.mubr.bf16.vlgmr.msra.gmra.mrb[8].mxu0 %v6258_v55 }
 0x2b6   : > { %2182 = vmatmul.mubr.bf16.vlgmr.msra.gmra.mrb[8].mxu1 %v6258_v55  ;;  %4599 = vmatprep.mubr.msk.bf16.mxu0 %vm5559_vm2, %v5558_v57 }
 0x2b7   : > { %4605 = vmatprep.mubr.msk.bf16.mxu1 %vm5559_vm2, %v5558_v57 }
 0x347   : > { %v4473_v58 = vpop.f32.mrb[0].mxu0 }
 0x348   : > { %v4474_v59 = vpop.f32.mrb[1].mxu0  ;;  %v4495_v60 = vpop.f32.mrb[0].mxu1 }
 0x349   : > { %v4475_v61 = vadd.f32 %v4474_v59, %v4473_v58  ;;  %v4476_v62 = vpop.f32.mrb[2].mxu0  ;;  %v4496_v63 = vpop.f32.mrb[1].mxu1 }
 0x34a   : > { %v4477_v0 = vpop.f32.mrb[3].mxu0  ;;  %v4497_v55 = vadd.f32 %v4496_v63, %v4495_v60  ;;  %v4498_v1 = vpop.f32.mrb[2].mxu1 }
 0x34b   : > { %v4499_v2 = vpop.f32.mrb[3].mxu1  ;;  %v1348_v19 = vadd.f32 %v4475_v61, %v4180_v9  ;;  %v4884_v1 = vld [vmem:[%s6853_s12 + $0x4] ss:$8 sps:$4 sm:$0xff]   ;;  %v4887_v9 = vld [vmem:[%s6853_s12 + $0x14] ss:$8 sps:$4 sm:$0xff]  }
 0x34c   : > { %v1484_v20 = vadd.f32 %v4497_v55, %v4181_v10  ;;  %v4890_v2 = vld [vmem:[%s6853_s12 + $0x84] ss:$8 sps:$4 sm:$0xff]  }
 0x34d   : > { %v2189_v23 = vmul.f32 0.088388346, %v1348_v19  ;;  %v4899_v19 = vld [vmem:[%s6853_s12 + $0x34] ss:$8 sps:$4 sm:$0xff]  }
 0x34e   : > { %v2190_v24 = vmul.f32 0.088388346, %v1484_v20  ;;  %v4902_v20 = vld [vmem:[%s6853_s12 + $0xa4] ss:$8 sps:$4 sm:$0xff]  }
 0x34f   : > { %v2191_v25 = vpack.c.bf16 %v2189_v23, %v2189_v23  ;;  %v4905_v23 = vld [vmem:[%s6853_s12 + $0x44] ss:$8 sps:$4 sm:$0xff]  }
 0x350   : > { %v2192_v26 = vpack.c.bf16 %v2190_v24, %v2190_v24  ;;  %v4908_v24 = vld [vmem:[%s6853_s12 + $0xb4] ss:$8 sps:$4 sm:$0xff]  }
 0x367   : > { %v4517_v3 = vpop.f32.mrb[4].mxu0 }
 0x368   : > { %v4539_v4 = vpop.f32.mrb[4].mxu1  ;;  %v4518_v6 = vpop.f32.mrb[5].mxu0 }
 0x369   : > { %v4540_v8 = vpop.f32.mrb[5].mxu1  ;;  %v4519_v11 = vadd.f32 %v4518_v6, %v4517_v3  ;;  %v4520_v13 = vpop.f32.mrb[6].mxu0 }
 0x36a   : > { %v4541_v12 = vadd.f32 %v4540_v8, %v4539_v4  ;;  %v4542_v14 = vpop.f32.mrb[6].mxu1  ;;  %v4521_v15 = vpop.f32.mrb[7].mxu0  ;;  %v4888_v13 = vld [vmem:[%s6853_s12 + $0x80] ss:$8 sps:$4 sm:$0xff]  }
 0x36b   : > { %v4543_v16 = vpop.f32.mrb[7].mxu1  ;;  %v1698_v17 = vadd.f32 %v4519_v11, %v4214_v5  ;;  %v4893_v15 = vld [vmem:[%s6853_s12 + $0x24] ss:$8 sps:$4 sm:$0xff]  }
 0x36c   : > { %v1834_v18 = vadd.f32 %v4541_v12, %v4215_v7  ;;  %v4882_v7 = vld [vmem:[%s6853_s12] ss:$8 sps:$4 sm:$0xff]   ;;  %v4885_v12 = vld [vmem:[%s6853_s12 + $0x10] ss:$8 sps:$4 sm:$0xff]   ;;  %v4896_v16 = vld [vmem:[%s6853_s12 + $0x94] ss:$8 sps:$4 sm:$0xff]  }
 0x36d   : > { %v2193_v21 = vpack.c.bf16 %v1698_v17, %v1698_v17  ;;  %v4891_v17 = vld [vmem:[%s6853_s12 + $0x20] ss:$8 sps:$4 sm:$0xff]  }
 0x36e   : > { %v2194_v22 = vpack.c.bf16 %v1834_v18, %v1834_v18  ;;  %v4894_v18 = vld [vmem:[%s6853_s12 + $0x90] ss:$8 sps:$4 sm:$0xff]  }
 0x36f   : > { %4598 = vmatpush3.bf16.xpose.msra.mxu0 %v2193_v21  ;;  %v4897_v21 = vld [vmem:[%s6853_s12 + $0x30] ss:$8 sps:$4 sm:$0xff]  }
 0x370   : > { %4604 = vmatpush3.bf16.xpose.msra.mxu1 %v2194_v22  ;;  %4609 = vmatprep.subr.bf16.mxu0 %v5558_v57  ;;  %v4900_v22 = vld [vmem:[%s6853_s12 + $0xa0] ss:$8 sps:$4 sm:$0xff]  }
 0x371   : > { %4615 = vmatprep.subr.bf16.mxu1 %v5558_v57 }
 0x376   : > { %4600 = vmatmul.mubr.bf16.vlgmr.msra.gmra.mrb[12].mxu0 %v2191_v25  ;;  %v4903_v25 = vld [vmem:[%s6853_s12 + $0x40] ss:$8 sps:$4 sm:$0xff]  }
 0x377   : > { %4606 = vmatmul.mubr.bf16.vlgmr.msra.gmra.mrb[12].mxu1 %v2192_v26  ;;  %4611 = vmatprep.mubr.msk.bf16.mxu0 %vm5559_vm2, %v5558_v57  ;;  %v4906_v26 = vld [vmem:[%s6853_s12 + $0xb0] ss:$8 sps:$4 sm:$0xff]  }
 0x378   : > { %4617 = vmatprep.mubr.msk.bf16.mxu1 %vm5559_vm2, %v5558_v57 }
 0x388   : > { %v4561_v27 = vpop.f32.mrb[8].mxu0 }
 0x389   : > { %v4583_v28 = vpop.f32.mrb[8].mxu1  ;;  %v4562_v30 = vpop.f32.mrb[9].mxu0 }
 0x38a   : > { %v4584_v31 = vpop.f32.mrb[9].mxu1  ;;  %v4563_v32 = vadd.f32 %v4562_v30, %v4561_v27  ;;  %v4564_v33 = vpop.f32.mrb[10].mxu0  ;;  %v4911_v27 = vld [vmem:[%s6853_s12 + $0x54] ss:$8 sps:$4 sm:$0xff]   ;;  %v4912_v30 = vld [vmem:[%s6853_s12 + $0xc0] ss:$8 sps:$4 sm:$0xff]  }
 0x38b   : > { %v4585_v34 = vadd.f32 %v4584_v31, %v4583_v28  ;;  %v4586_v35 = vpop.f32.mrb[10].mxu1  ;;  %v4565_v36 = vpop.f32.mrb[11].mxu0  ;;  %v4914_v28 = vld [vmem:[%s6853_s12 + $0xc4] ss:$8 sps:$4 sm:$0xff]   ;;  %v4915_v33 = vld [vmem:[%s6853_s12 + $0x60] ss:$8 sps:$4 sm:$0xff]  }
 0x38c   : > { %v4587_v37 = vpop.f32.mrb[11].mxu1  ;;  %v2048_v38 = vadd.f32 %v4563_v32, %v4248_v29  ;;  %v4909_v29 = vld [vmem:[%s6853_s12 + $0x50] ss:$8 sps:$4 sm:$0xff]   ;;  %v4917_v31 = vld [vmem:[%s6853_s12 + $0x64] ss:$8 sps:$4 sm:$0xff]  }
 0x38d   : > { %v2184_v41 = vadd.f32 %v4585_v34, %v4249_v39  ;;  %v4920_v32 = vld [vmem:[%s6853_s12 + $0xd4] ss:$8 sps:$4 sm:$0xff]   ;;  %v4918_v34 = vld [vmem:[%s6853_s12 + $0xd0] ss:$8 sps:$4 sm:$0xff]   ;;  %v4926_v36 = vld [vmem:[%s6853_s12 + $0xe4] ss:$8 sps:$4 sm:$0xff]  }
 0x38e   : > { %v2195_v40 = vpack.c.bf16 %v2048_v38, %v2048_v38  ;;  %v4923_v35 = vld [vmem:[%s6853_s12 + $0x74] ss:$8 sps:$4 sm:$0xff]   ;;  %v4921_v37 = vld [vmem:[%s6853_s12 + $0x70] ss:$8 sps:$4 sm:$0xff]   ;;  %v4924_v38 = vld [vmem:[%s6853_s12 + $0xe0] ss:$8 sps:$4 sm:$0xff]  }
 0x38f   : > { %v2196_v42 = vpack.c.bf16 %v2184_v41, %v2184_v41  ;;  %v4929_v39 = vld [vmem:[%s6853_s12 + $0xf4] ss:$8 sps:$4 sm:$0xff]   ;;  %v4927_v41 = vld [vmem:[%s6853_s12 + $0xf0] ss:$8 sps:$4 sm:$0xff]  }
 0x390   : > { %v2307_v43 = vsel %vm2305_vm3, %v2195_v40, 0  ;;  %v5560_v40 = vmov 0  }
 0x391   : > { %4610 = vmatpush3.bf16.msra.mxu0 %v2307_v43  ;;  %v2353_v44 = vsel %vm2305_vm3, %v2196_v42, 0 }
 0x392   : > { %4616 = vmatpush3.bf16.msra.mxu1 %v2353_v44  ;;  %2509 = vmatprep.subr.bf16.mxu0 %v4884_v1 }
 0x393   : > { %2630 = vmatprep.subr.bf16.mxu1 %v4890_v2 }
 0x449   : > { %v2231_v45 = vpop.f32.mrb[12].mxu0 }
 0x44a   : > { %v2271_v46 = vpop.f32.mrb[12].mxu1  ;;  %v4601_v47 = vpop.f32.mrb[13].mxu0  ;;  %v2278_v49 = vsel %vm2277_vm4, %v2231_v45, -inf }
 0x44b   : > { %v4607_v48 = vpop.f32.mrb[13].mxu1  ;;  %2279 = vmax.xlane.f32.xlu0 %v2278_v49  ;;  %v2234_v51 = vpop.f32.mrb[14].mxu0  ;;  %v2281_v54 = vsel %vm2277_vm4, %v2271_v46, -inf }
 0x44c   : > { %v2274_v50 = vpop.f32.mrb[14].mxu1  ;;  %v4602_v52 = vpop.f32.mrb[15].mxu0 }
 0x44d   : > { %v4608_v53 = vpop.f32.mrb[15].mxu1  ;;  %v2675_v52 = vlaneseq }
 0x44f   : > { %2282 = vmax.xlane.f32.xlu0 %v2281_v54  ;;  %v6384_v53 = vshrl.u32 %v2675_v52, 7 }
 0x451   : > { %v6387_v54 = vsub.s32 0, %v6384_v53 }
 0x4d8   : > { %v2280_v56 = vpop.xlane.xlu0 %2279 }
 0x4d9   : > { %v2284_v57 = vsub.f32 %v2231_v45, %v2280_v56 }
 0x4db   : > { %v2286_v58 = vmul.f32 1.442695, %v2284_v57  ;;  %v2673_v57 = vld [vmem:[%s6855_s11] sm:$0x3] }
 0x4dc   : > { %v2283_v59 = vpop.xlane.xlu0 %2282 }
 0x4dd   : > { %5122 = vpow2.f32 %v2286_v58  ;;  %v2285_v60 = vsub.f32 %v2271_v46, %v2283_v59  ;;  %v6395_v58 = vsub.s32 1, %v6384_v53 }
 0x4df   : > { %v2288_v61 = vmul.f32 1.442695, %v2285_v60 }
 0x4e1   : > { %5124 = vpow2.f32 %v2288_v61 }
 0x4e7   : > { %v5123_v62 = vpop.eup %5122 }
 0x4e8   : > { %v2290_v63 = vsel %vm2277_vm4, %v5123_v62, 0.0 }
 0x4e9   : > { %2291 = vadd.xlane.f32.xlu1 %v2290_v63 }
 0x4eb   : > { %v5125_v0 = vpop.eup %5124 }
 0x4ec   : > { %v2293_v55 = vsel %vm2277_vm4, %v5125_v0, 0.0 }
 0x4ed   : > { %2294 = vadd.xlane.f32.xlu1 %v2293_v55 }
 0x576   : > { %v2292_v3 = vpop.xlane.xlu1 %2291 }
 0x577   : > { %5126 = vrcp.f32 %v2292_v3 }
 0x57a   : > { %v2295_v4 = vpop.xlane.xlu1 %2294 }
 0x57b   : > { %5128 = vrcp.f32 %v2295_v4 }
 0x581   : > { %v5127_v5 = vpop.eup %5126 }
 0x582   : > { %v2298_v6 = vmul.f32 %v5127_v5, %v5123_v62  ;;  %v2678_v62 = vrot.slane %v2673_v57, %v6387_v54 }
 0x584   : > { %v2300_v8 = vpack.c.bf16 %v2298_v6, %v2298_v6 }
 0x585   : > { %v5129_v10 = vpop.eup %5128 }
 0x586   : > { %v2299_v11 = vmul.f32 %v5129_v10, %v5125_v0  ;;  %4612 = vmatmul.mubr.msk.bf16.vlgmr.msra.gmra.mrb[16].mxu0 %vm2277_vm4, %v2300_v8  ;;  %v2682_v0 = vrot.slane %v2673_v57, %v6395_v58 }
 0x587   : > { %2510 = vmatpush1.bf16.msra.mxu0 %v4882_v7  ;;  %2541 = vmatprep.mubr.bf16.mxu0 %v5560_v40  ;;  %v5134_v7 = vld [vmem:[#allocation2] sm:$0xff] }
 0x588   : > { %v2301_v14 = vpack.c.bf16 %v2299_v11, %v2299_v11  ;;  %2511 = vmatprep.subr.bf16.mxu0 %v4887_v9  ;;  %v5135_v9 = vld [vmem:[#allocation2 + $0x8] sm:$0xff] }
 0x58a   : > { %4618 = vmatmul.mubr.msk.bf16.vlgmr.msra.gmra.mrb[16].mxu1 %vm2277_vm4, %v2301_v14  ;;  %v4933_v14 = vld [vmem:[%s6856_s25 + $0x8] ss:$16 sps:$4 sm:$0xff]  }
 0x58b   : > { %2512 = vmatpush1.bf16.msra.mxu0 %v4885_v12  ;;  %2631 = vmatpush1.bf16.msra.mxu1 %v4888_v13  ;;  %v4930_v12 = vld [vmem:[%s6856_s25] ss:$16 sps:$4 sm:$0xff]   ;;  %v4932_v13 = vld [vmem:[%s6856_s25 + $0x4] ss:$16 sps:$4 sm:$0xff]  }
 0x58c   : > { %2513 = vmatprep.subr.bf16.mxu0 %v4893_v15  ;;  %2632 = vmatprep.subr.bf16.mxu1 %v4896_v16  ;;  %v4935_v15 = vld [vmem:[%s6856_s25 + $0xc] ss:$16 sps:$4 sm:$0xff]   ;;  %v4938_v16 = vld [vmem:[%s6856_s25 + $0x24] ss:$16 sps:$4 sm:$0xff]  }
 0x58d   : > { %2662 = vmatprep.mubr.bf16.mxu1 %v5560_v40  ;;  %v4974_v40 = vld [vmem:[%s6856_s25 + $0xe4] ss:$16 sps:$4 sm:$0xff]  }
 0x58f   : > { %2514 = vmatpush1.bf16.msra.mxu0 %v4891_v17  ;;  %2633 = vmatpush1.bf16.msra.mxu1 %v4894_v18  ;;  %v4941_v17 = vld [vmem:[%s6856_s25 + $0x2c] ss:$16 sps:$4 sm:$0xff]   ;;  %v4936_v18 = vld [vmem:[%s6856_s25 + $0x20] ss:$16 sps:$4 sm:$0xff]  }
 0x590   : > { %2515 = vmatprep.subr.bf16.mxu0 %v4899_v19  ;;  %2634 = vmatprep.subr.bf16.mxu1 %v4902_v20  ;;  %v4939_v19 = vld [vmem:[%s6856_s25 + $0x28] ss:$16 sps:$4 sm:$0xff]   ;;  %v4944_v20 = vld [vmem:[%s6856_s25 + $0x44] ss:$16 sps:$4 sm:$0xff]  }
 0x593   : > { %2516 = vmatpush1.bf16.msra.mxu0 %v4897_v21  ;;  %2635 = vmatpush1.bf16.msra.mxu1 %v4900_v22  ;;  %v4947_v21 = vld [vmem:[%s6856_s25 + $0x4c] ss:$16 sps:$4 sm:$0xff]   ;;  %v4942_v22 = vld [vmem:[%s6856_s25 + $0x40] ss:$16 sps:$4 sm:$0xff]  }
 0x594   : > { %2517 = vmatprep.subr.bf16.mxu0 %v4905_v23  ;;  %2636 = vmatprep.subr.bf16.mxu1 %v4908_v24  ;;  %v4945_v23 = vld [vmem:[%s6856_s25 + $0x48] ss:$16 sps:$4 sm:$0xff]   ;;  %v4950_v24 = vld [vmem:[%s6856_s25 + $0x64] ss:$16 sps:$4 sm:$0xff]  }
 0x597   : > { %2518 = vmatpush1.bf16.msra.mxu0 %v4903_v25  ;;  %2637 = vmatpush1.bf16.msra.mxu1 %v4906_v26  ;;  %v4953_v25 = vld [vmem:[%s6856_s25 + $0x6c] ss:$16 sps:$4 sm:$0xff]   ;;  %v4948_v26 = vld [vmem:[%s6856_s25 + $0x60] ss:$16 sps:$4 sm:$0xff]  }
 0x598   : > { %2519 = vmatprep.subr.bf16.mxu0 %v4911_v27  ;;  %2638 = vmatprep.subr.bf16.mxu1 %v4914_v28  ;;  %v4951_v27 = vld [vmem:[%s6856_s25 + $0x68] ss:$16 sps:$4 sm:$0xff]   ;;  %v4956_v28 = vld [vmem:[%s6856_s25 + $0x84] ss:$16 sps:$4 sm:$0xff]  }
 0x59b   : > { %2520 = vmatpush1.bf16.msra.mxu0 %v4909_v29  ;;  %2639 = vmatpush1.bf16.msra.mxu1 %v4912_v30  ;;  %v4959_v29 = vld [vmem:[%s6856_s25 + $0x8c] ss:$16 sps:$4 sm:$0xff]   ;;  %v4954_v30 = vld [vmem:[%s6856_s25 + $0x80] ss:$16 sps:$4 sm:$0xff]  }
 0x59c   : > { %2521 = vmatprep.subr.bf16.mxu0 %v4917_v31  ;;  %2640 = vmatprep.subr.bf16.mxu1 %v4920_v32  ;;  %v4957_v31 = vld [vmem:[%s6856_s25 + $0x88] ss:$16 sps:$4 sm:$0xff]   ;;  %v4962_v32 = vld [vmem:[%s6856_s25 + $0xa4] ss:$16 sps:$4 sm:$0xff]  }
 0x59f   : > { %2522 = vmatpush1.bf16.msra.mxu0 %v4915_v33  ;;  %2641 = vmatpush1.bf16.msra.mxu1 %v4918_v34  ;;  %v4965_v33 = vld [vmem:[%s6856_s25 + $0xac] ss:$16 sps:$4 sm:$0xff]   ;;  %v4960_v34 = vld [vmem:[%s6856_s25 + $0xa0] ss:$16 sps:$4 sm:$0xff]  }
 0x5a0   : > { %2523 = vmatprep.subr.bf16.mxu0 %v4923_v35  ;;  %2642 = vmatprep.subr.bf16.mxu1 %v4926_v36  ;;  %v4963_v35 = vld [vmem:[%s6856_s25 + $0xa8] ss:$16 sps:$4 sm:$0xff]   ;;  %v4968_v36 = vld [vmem:[%s6856_s25 + $0xc4] ss:$16 sps:$4 sm:$0xff]  }
 0x5a3   : > { %2524 = vmatpush1.bf16.msra.mxu0 %v4921_v37  ;;  %2643 = vmatpush1.bf16.msra.mxu1 %v4924_v38  ;;  %v4971_v37 = vld [vmem:[%s6856_s25 + $0xcc] ss:$16 sps:$4 sm:$0xff]   ;;  %v4966_v38 = vld [vmem:[%s6856_s25 + $0xc0] ss:$16 sps:$4 sm:$0xff]  }
 0x5a4   : > { %2644 = vmatprep.subr.bf16.mxu1 %v4929_v39  ;;  %3142 = vmatprep.subr.bf16.mxu0 %v4932_v13  ;;  %v4969_v39 = vld [vmem:[%s6856_s25 + $0xc8] ss:$16 sps:$4 sm:$0xff]  }
 0x5a5   : > { %v5011_v13 = vld [vmem:[%s6856_s25 + $0x1a8] ss:$16 sps:$4 sm:$0xff]  }
 0x5a7   : > { %2645 = vmatpush1.bf16.msra.mxu1 %v4927_v41  ;;  %v4977_v41 = vld [vmem:[%s6856_s25 + $0xec] ss:$16 sps:$4 sm:$0xff]  }
 0x5a8   : > { %3183 = vmatprep.subr.bf16.mxu1 %v4935_v15  ;;  %v5019_v15 = vld [vmem:[%s6856_s25 + $0x1cc] ss:$16 sps:$4 sm:$0xff]  }
 0x659   : > { %v2343_v42 = vpop.f32.mrb[16].mxu0 }
 0x65a   : > { %v2395_v43 = vpack.c.bf16 %v2343_v42, %v2343_v42  ;;  %v4613_v44 = vpop.f32.mrb[17].mxu0  ;;  %v4972_v42 = vld [vmem:[%s6856_s25 + $0xe0] ss:$16 sps:$4 sm:$0xff]  }
 0x65b   : > { %v2346_v45 = vpop.f32.mrb[18].mxu0  ;;  %v4980_v44 = vld [vmem:[%s6856_s25 + $0x104] ss:$16 sps:$4 sm:$0xff]  }
 0x65c   : > { %v4614_v46 = vpop.f32.mrb[19].mxu0  ;;  %2542 = vmatmul.mubr.bf16.vlgmr.msra.gmra.mrb[20].mxu0 %v2395_v43  ;;  %v4975_v43 = vld [vmem:[%s6856_s25 + $0xe8] ss:$16 sps:$4 sm:$0xff]   ;;  %v4983_v45 = vld [vmem:[%s6856_s25 + $0x10c] ss:$16 sps:$4 sm:$0xff]  }
 0x65d   : > { %v2389_v47 = vpop.f32.mrb[16].mxu1  ;;  %3143 = vmatpush1.bf16.msra.mxu0 %v4930_v12  ;;  %v4978_v46 = vld [vmem:[%s6856_s25 + $0x100] ss:$16 sps:$4 sm:$0xff]  }
 0x65e   : > { %v2396_v48 = vpack.c.bf16 %v2389_v47, %v2389_v47  ;;  %v4619_v49 = vpop.f32.mrb[17].mxu1  ;;  %3144 = vmatprep.subr.bf16.mxu0 %v4938_v16  ;;  %v4981_v47 = vld [vmem:[%s6856_s25 + $0x108] ss:$16 sps:$4 sm:$0xff]   ;;  %v5008_v12 = vld [vmem:[%s6856_s25 + $0x1a0] ss:$16 sps:$4 sm:$0xff]  }
 0x65f   : > { %v2392_v50 = vpop.f32.mrb[18].mxu1  ;;  %v4989_v49 = vld [vmem:[%s6856_s25 + $0x12c] ss:$16 sps:$4 sm:$0xff]   ;;  %v5014_v16 = vld [vmem:[%s6856_s25 + $0x1c0] ss:$16 sps:$4 sm:$0xff]  }
 0x660   : > { %v4620_v51 = vpop.f32.mrb[19].mxu1  ;;  %2663 = vmatmul.mubr.bf16.vlgmr.msra.gmra.mrb[20].mxu1 %v2396_v48  ;;  %v4986_v48 = vld [vmem:[%s6856_s25 + $0x124] ss:$16 sps:$4 sm:$0xff]   ;;  %v4984_v50 = vld [vmem:[%s6856_s25 + $0x120] ss:$16 sps:$4 sm:$0xff]  }
 0x661   : > { %3184 = vmatpush1.bf16.msra.mxu1 %v4933_v14  ;;  %3145 = vmatpush1.bf16.msra.mxu0 %v4936_v18  ;;  %v4987_v51 = vld [vmem:[%s6856_s25 + $0x128] ss:$16 sps:$4 sm:$0xff]   ;;  %v5016_v14 = vld [vmem:[%s6856_s25 + $0x1c4] ss:$16 sps:$4 sm:$0xff]  }
 0x662   : > { %3185 = vmatprep.subr.bf16.mxu1 %v4941_v17  ;;  %3146 = vmatprep.subr.bf16.mxu0 %v4944_v20  ;;  %v5017_v17 = vld [vmem:[%s6856_s25 + $0x1c8] ss:$16 sps:$4 sm:$0xff]   ;;  %v5022_v18 = vld [vmem:[%s6856_s25 + $0x1e4] ss:$16 sps:$4 sm:$0xff]   ;;  %v5020_v20 = vld [vmem:[%s6856_s25 + $0x1e0] ss:$16 sps:$4 sm:$0xff]  }
 0x665   : > { %3186 = vmatpush1.bf16.msra.mxu1 %v4939_v19  ;;  %3147 = vmatpush1.bf16.msra.mxu0 %v4942_v22  ;;  %v5025_v19 = vld [vmem:[%s6856_s25 + $0x1ec] ss:$16 sps:$4 sm:$0xff]  }
 0x666   : > { %3187 = vmatprep.subr.bf16.mxu1 %v4947_v21  ;;  %3148 = vmatprep.subr.bf16.mxu0 %v4950_v24  ;;  %v5023_v21 = vld [vmem:[%s6856_s25 + $0x1e8] ss:$16 sps:$4 sm:$0xff]  }
 0x667   : > { %v5028_v22 = vld [vmem:[%s6218_s30 + $0x4] ss:$8 sps:$4 sm:$0xff]  }
 0x669   : > { %3188 = vmatpush1.bf16.msra.mxu1 %v4945_v23  ;;  %3149 = vmatpush1.bf16.msra.mxu0 %v4948_v26  ;;  %v5031_v23 = vld [vmem:[%s6218_s30 + $0x104] ss:$8 sps:$4 sm:$0xff]  }
 0x66a   : > { %3189 = vmatprep.subr.bf16.mxu1 %v4953_v25  ;;  %3150 = vmatprep.subr.bf16.mxu0 %v4956_v28  ;;  %v2690_v28 = vld [vmem:[%s1039_s0] sm:$0x3] }
 0x66d   : > { %3190 = vmatpush1.bf16.msra.mxu1 %v4951_v27  ;;  %3151 = vmatpush1.bf16.msra.mxu0 %v4954_v30  ;;  %v2689_v27 = vld [vmem:[%s6858_s19] sm:$0x3] }
 0x66e   : > { %3191 = vmatprep.subr.bf16.mxu1 %v4959_v29  ;;  %3152 = vmatprep.subr.bf16.mxu0 %v4962_v32  ;;  %v2712_v29 = vrot.slane %v2689_v27, %v6387_v54  ;;  %v2716_v30 = vrot.slane %v2689_v27, %v6395_v58  ;;  %v5100_v27 = vld [vmem:[%s6218_s30 + $0xc4] ss:$8 sps:$4 sm:$0xff]  }
 0x671   : > { %3192 = vmatpush1.bf16.msra.mxu1 %v4957_v31  ;;  %3153 = vmatpush1.bf16.msra.mxu0 %v4960_v34  ;;  %v2725_v34 = vrot.slane %v2690_v28, %v6387_v54 }
 0x672   : > { %3193 = vmatprep.subr.bf16.mxu1 %v4965_v33  ;;  %3154 = vmatprep.subr.bf16.mxu0 %v4968_v36 }
 0x675   : > { %3194 = vmatpush1.bf16.msra.mxu1 %v4963_v35  ;;  %3155 = vmatpush1.bf16.msra.mxu0 %v4966_v38  ;;  %v2729_v35 = vrot.slane %v2690_v28, %v6395_v58  ;;  %v5103_v28 = vld [vmem:[%s6218_s30 + $0x1c4] ss:$8 sps:$4 sm:$0xff]  }
 0x676   : > { %3195 = vmatprep.subr.bf16.mxu1 %v4971_v37  ;;  %3156 = vmatprep.subr.bf16.mxu0 %v4974_v40 }
 0x679   : > { %3196 = vmatpush1.bf16.msra.mxu1 %v4969_v39  ;;  %3157 = vmatpush1.bf16.msra.mxu0 %v4972_v42  ;;  %v5026_v42 = vld [vmem:[%s6218_s30] ss:$8 sps:$4 sm:$0xff]  }
 0x67a   : > { %3197 = vmatprep.subr.bf16.mxu1 %v4977_v41  ;;  %3158 = vmatprep.subr.bf16.mxu0 %v4980_v44  ;;  %v5034_v44 = vld [vmem:[%s6218_s30 + $0x14] ss:$8 sps:$4 sm:$0xff]  }
 0x67d   : > { %3198 = vmatpush1.bf16.msra.mxu1 %v4975_v43  ;;  %3159 = vmatpush1.bf16.msra.mxu0 %v4978_v46  ;;  %v5029_v43 = vld [vmem:[%s6218_s30 + $0x100] ss:$8 sps:$4 sm:$0xff]   ;;  %v5032_v46 = vld [vmem:[%s6218_s30 + $0x10] ss:$8 sps:$4 sm:$0xff]  }
 0x67e   : > { %3199 = vmatprep.subr.bf16.mxu1 %v4983_v45  ;;  %3160 = vmatprep.subr.bf16.mxu0 %v4986_v48  ;;  %v5037_v45 = vld [vmem:[%s6218_s30 + $0x114] ss:$8 sps:$4 sm:$0xff]   ;;  %v5040_v48 = vld [vmem:[%s6218_s30 + $0x24] ss:$8 sps:$4 sm:$0xff]  }
 0x681   : > { %3200 = vmatpush1.bf16.msra.mxu1 %v4981_v47  ;;  %3161 = vmatpush1.bf16.msra.mxu0 %v4984_v50  ;;  %v5035_v47 = vld [vmem:[%s6218_s30 + $0x110] ss:$8 sps:$4 sm:$0xff]   ;;  %v5038_v50 = vld [vmem:[%s6218_s30 + $0x20] ss:$8 sps:$4 sm:$0xff]  }
 0x682   : > { %3201 = vmatprep.subr.bf16.mxu1 %v4989_v49  ;;  %v5043_v49 = vld [vmem:[%s6218_s30 + $0x124] ss:$8 sps:$4 sm:$0xff]  }
 0x685   : > { %3202 = vmatpush1.bf16.msra.mxu1 %v4987_v51  ;;  %v5041_v51 = vld [vmem:[%s6218_s30 + $0x120] ss:$8 sps:$4 sm:$0xff]  }
 0x72f   : > { %v2543_v56 = vpop.f32.mrb[20].mxu0 }
 0x730   : > { %v2545_v59 = vpop.f32.mrb[21].mxu0 }
 0x731   : > { %v2547_v60 = vpop.f32.mrb[22].mxu0 }
 0x732   : > { %v2548_v61 = vpop.f32.mrb[23].mxu0 }
 0x733   : > { %v2664_v63 = vpop.f32.mrb[20].mxu1 }
 0x734   : > { %v2671_v55 = vadd.f32 %v2664_v63, %v2543_v56  ;;  %v2666_v1 = vpop.f32.mrb[21].mxu1  ;;  %v4992_v63 = vld [vmem:[%s6856_s25 + $0x144] ss:$16 sps:$4 sm:$0xff]  }
 0x735   : > { %v2672_v2 = vadd.f32 %v2666_v1, %v2545_v59  ;;  %v2668_v3 = vpop.f32.mrb[22].mxu1  ;;  %v4993_v1 = vld [vmem:[%s6856_s25 + $0x148] ss:$16 sps:$4 sm:$0xff]   ;;  %3162 = vmatprep.subr.bf16.mxu0 %v4992_v63 }
 0x736   : > { %v2685_v4 = vadd.f32 %v2678_v62, %v2671_v55  ;;  %v2669_v5 = vpop.f32.mrb[23].mxu1  ;;  %v4990_v55 = vld [vmem:[%s6856_s25 + $0x140] ss:$16 sps:$4 sm:$0xff]   ;;  %v5001_v3 = vld [vmem:[%s6856_s25 + $0x16c] ss:$16 sps:$4 sm:$0xff]  }
 0x737   : > { %v2686_v6 = vadd.f32 %v2682_v0, %v2672_v2  ;;  %v4995_v0 = vld [vmem:[%s6856_s25 + $0x14c] ss:$16 sps:$4 sm:$0xff]   ;;  %3163 = vmatpush1.bf16.msra.mxu0 %v4990_v55  ;;  %v4998_v2 = vld [vmem:[%s6856_s25 + $0x164] ss:$16 sps:$4 sm:$0xff]   ;;  %v4999_v5 = vld [vmem:[%s6856_s25 + $0x168] ss:$16 sps:$4 sm:$0xff]  }
 0x738   : > { %v6399_v8 = vadd.f32 %v5134_v7, %v2685_v4  ;;  %3203 = vmatprep.subr.bf16.mxu1 %v4995_v0  ;;  %v4996_v4 = vld [vmem:[%s6856_s25 + $0x160] ss:$16 sps:$4 sm:$0xff]   ;;  %3164 = vmatprep.subr.bf16.mxu0 %v4998_v2  ;;  %v5007_v7 = vld [vmem:[%s6856_s25 + $0x18c] ss:$16 sps:$4 sm:$0xff]  }
 0x739   : > { %v6401_v10 = vadd.f32 %v5135_v9, %v2686_v6  ;;  %3204 = vmatpush1.bf16.msra.mxu1 %v4993_v1  ;;  %v5004_v6 = vld [vmem:[%s6856_s25 + $0x184] ss:$16 sps:$4 sm:$0xff]   ;;  %v5005_v9 = vld [vmem:[%s6856_s25 + $0x188] ss:$16 sps:$4 sm:$0xff]  }
 0x73a   : > { %3205 = vmatprep.subr.bf16.mxu1 %v5001_v3  ;;  %v5053_v63 = vld [vmem:[%s6218_s30 + $0x140] ss:$8 sps:$4 sm:$0xff]   ;;  %v5058_v0 = vld [vmem:[%s6218_s30 + $0x54] ss:$8 sps:$4 sm:$0xff]   ;;  %v5056_v1 = vld [vmem:[%s6218_s30 + $0x50] ss:$8 sps:$4 sm:$0xff]  }
 0x73b   : > { %v2691_v11 = vadd.f32 %v6401_v10, %v6399_v8  ;;  %3165 = vmatpush1.bf16.msra.mxu0 %v4996_v4  ;;  %v5061_v55 = vld [vmem:[%s6218_s30 + $0x154] ss:$8 sps:$4 sm:$0xff]   ;;  %v5059_v2 = vld [vmem:[%s6218_s30 + $0x150] ss:$8 sps:$4 sm:$0xff]   ;;  %v5064_v3 = vld [vmem:[%s6218_s30 + $0x64] ss:$8 sps:$4 sm:$0xff]  }
 0x73c   : > { %3166 = vmatprep.subr.bf16.mxu0 %v5004_v6  ;;  %v5067_v4 = vld [vmem:[%s6218_s30 + $0x164] ss:$8 sps:$4 sm:$0xff]   ;;  %v5065_v6 = vld [vmem:[%s6218_s30 + $0x160] ss:$8 sps:$4 sm:$0xff]  }
 0x73d   : > { %2692 = vadd.xlane.f32.xlu0 %v2691_v11  ;;  %3206 = vmatpush1.bf16.msra.mxu1 %v4999_v5  ;;  %v5013_v11 = vld [vmem:[%s6856_s25 + $0x1ac] ss:$16 sps:$4 sm:$0xff]  }
 0x73e   : > { %3207 = vmatprep.subr.bf16.mxu1 %v5007_v7  ;;  %v5062_v5 = vld [vmem:[%s6218_s30 + $0x60] ss:$8 sps:$4 sm:$0xff]   ;;  %v5070_v7 = vld [vmem:[%s6218_s30 + $0x74] ss:$8 sps:$4 sm:$0xff]  }
 0x741   : > { %3208 = vmatpush1.bf16.msra.mxu1 %v5005_v9  ;;  %v5068_v9 = vld [vmem:[%s6218_s30 + $0x70] ss:$8 sps:$4 sm:$0xff]  }
 0x742   : > { %3209 = vmatprep.subr.bf16.mxu1 %v5013_v11  ;;  %v5076_v11 = vld [vmem:[%s6218_s30 + $0x84] ss:$8 sps:$4 sm:$0xff]  }
 0x745   : > { %3210 = vmatpush1.bf16.msra.mxu1 %v5011_v13  ;;  %v5074_v13 = vld [vmem:[%s6218_s30 + $0x80] ss:$8 sps:$4 sm:$0xff]  }
 0x746   : > { %3211 = vmatprep.subr.bf16.mxu1 %v5019_v15  ;;  %v5082_v15 = vld [vmem:[%s6218_s30 + $0x94] ss:$8 sps:$4 sm:$0xff]  }
 0x749   : > { %3212 = vmatpush1.bf16.msra.mxu1 %v5017_v17  ;;  %v5080_v17 = vld [vmem:[%s6218_s30 + $0x90] ss:$8 sps:$4 sm:$0xff]  }
 0x74a   : > { %3213 = vmatprep.subr.bf16.mxu1 %v5025_v19  ;;  %v5088_v19 = vld [vmem:[%s6218_s30 + $0xa4] ss:$8 sps:$4 sm:$0xff]  }
 0x74d   : > { %3214 = vmatpush1.bf16.msra.mxu1 %v5023_v21  ;;  %v5086_v21 = vld [vmem:[%s6218_s30 + $0xa0] ss:$8 sps:$4 sm:$0xff]  }
 0x74e   : > { %3669 = vmatprep.subr.bf16.mxu1 %v5031_v23  ;;  %v5094_v23 = vld [vmem:[%s6218_s30 + $0xb4] ss:$8 sps:$4 sm:$0xff]  }
 0x7ca   : > { %v2693_v52 = vpop.xlane.xlu0 %2692 }
 0x7cb   : > { %v2695_v56 = vmul.f32 0.00390625, %v2693_v52  ;;  %v5046_v52 = vld [vmem:[%s6218_s30 + $0x34] ss:$8 sps:$4 sm:$0xff]  }
 0x7cd   : > { %v6446_v57 = vsub.f32 %v6399_v8, %v2695_v56  ;;  %v6449_v59 = vsub.f32 %v6401_v10, %v2695_v56  ;;  %v5002_v8 = vld [vmem:[%s6856_s25 + $0x180] ss:$16 sps:$4 sm:$0xff]   ;;  %v5010_v10 = vld [vmem:[%s6856_s25 + $0x1a4] ss:$16 sps:$4 sm:$0xff]  }
 0x7ce   : > { %3167 = vmatpush1.bf16.msra.mxu0 %v5002_v8  ;;  %v5049_v56 = vld [vmem:[%s6218_s30 + $0x134] ss:$8 sps:$4 sm:$0xff]  }
 0x7cf   : > { %v2698_v60 = vmul.f32 %v6446_v57, %v6446_v57  ;;  %v2699_v61 = vmul.f32 %v6449_v59, %v6449_v59  ;;  %3168 = vmatprep.subr.bf16.mxu0 %v5010_v10  ;;  %v5073_v8 = vld [vmem:[%s6218_s30 + $0x174] ss:$8 sps:$4 sm:$0xff]   ;;  %v5071_v10 = vld [vmem:[%s6218_s30 + $0x170] ss:$8 sps:$4 sm:$0xff]  }
 0x7d1   : > { %v2700_v62 = vadd.f32 %v2699_v61, %v2698_v60  ;;  %v5052_v60 = vld [vmem:[%s6218_s30 + $0x44] ss:$8 sps:$4 sm:$0xff]  }
 0x7d2   : > { %3169 = vmatpush1.bf16.msra.mxu0 %v5008_v12  ;;  %v5055_v61 = vld [vmem:[%s6218_s30 + $0x144] ss:$8 sps:$4 sm:$0xff]  }
 0x7d3   : > { %2701 = vadd.xlane.f32.xlu1 %v2700_v62  ;;  %3170 = vmatprep.subr.bf16.mxu0 %v5016_v14  ;;  %v5050_v62 = vld [vmem:[%s6218_s30 + $0x40] ss:$8 sps:$4 sm:$0xff]   ;;  %v5079_v12 = vld [vmem:[%s6218_s30 + $0x184] ss:$8 sps:$4 sm:$0xff]  }
 0x7d4   : > { %v5077_v14 = vld [vmem:[%s6218_s30 + $0x180] ss:$8 sps:$4 sm:$0xff]  }
 0x7d6   : > { %3171 = vmatpush1.bf16.msra.mxu0 %v5014_v16  ;;  %v5085_v16 = vld [vmem:[%s6218_s30 + $0x194] ss:$8 sps:$4 sm:$0xff]  }
 0x7d7   : > { %3172 = vmatprep.subr.bf16.mxu0 %v5022_v18  ;;  %v5083_v18 = vld [vmem:[%s6218_s30 + $0x190] ss:$8 sps:$4 sm:$0xff]  }
 0x7da   : > { %3173 = vmatpush1.bf16.msra.mxu0 %v5020_v20  ;;  %v5091_v20 = vld [vmem:[%s6218_s30 + $0x1a4] ss:$8 sps:$4 sm:$0xff]  }
 0x7db   : > { %3628 = vmatprep.subr.bf16.mxu0 %v5028_v22  ;;  %v5089_v22 = vld [vmem:[%s6218_s30 + $0x1a0] ss:$8 sps:$4 sm:$0xff]  }
 0x860   : > { %v2702_v24 = vpop.xlane.xlu1 %2701 }
 0x861   : > { %v2703_v25 = vmul.f32 0.00390625, %v2702_v24  ;;  %v5097_v24 = vld [vmem:[%s6218_s30 + $0x1b4] ss:$8 sps:$4 sm:$0xff]  }
 0x863   : > { %v2704_v26 = vadd.f32 1e-05, %v2703_v25  ;;  %v5092_v25 = vld [vmem:[%s6218_s30 + $0xb0] ss:$8 sps:$4 sm:$0xff]  }
 0x865   : > { %5130 = vrsqrt.f32 %v2704_v26  ;;  %v5095_v26 = vld [vmem:[%s6218_s30 + $0x1b0] ss:$8 sps:$4 sm:$0xff]  }
 0x86f   : > { %v5131_v31 = vpop.eup %5130 }
 0x870   : > { %v2706_v32 = vmul.f32 %v5131_v31, %v6446_v57  ;;  %v2707_v33 = vmul.f32 %v5131_v31, %v6449_v59  ;;  %v5044_v57 = vld [vmem:[%s6218_s30 + $0x30] ss:$8 sps:$4 sm:$0xff]   ;;  %v5106_v31 = vld [vmem:[%s6218_s30 + $0xd4] ss:$8 sps:$4 sm:$0xff]  }
 0x871   : > { %v5047_v59 = vld [vmem:[%s6218_s30 + $0x130] ss:$8 sps:$4 sm:$0xff]  }
 0x872   : > { %v2720_v36 = vmul.f32 %v2716_v30, %v2707_v33  ;;  %v2719_v37 = vmul.f32 %v2712_v29, %v2706_v32  ;;  %v5098_v29 = vld [vmem:[%s6218_s30 + $0xc0] ss:$8 sps:$4 sm:$0xff]   ;;  %v5109_v32 = vld [vmem:[%s6218_s30 + $0x1d4] ss:$8 sps:$4 sm:$0xff]   ;;  %v5104_v33 = vld [vmem:[%s6218_s30 + $0xd0] ss:$8 sps:$4 sm:$0xff]  }
 0x873   : > { %v5101_v30 = vld [vmem:[%s6218_s30 + $0x1c0] ss:$8 sps:$4 sm:$0xff]  }
 0x874   : > { %v6497_v38 = vadd.f32 %v2729_v35, %v2720_v36  ;;  %v6499_v39 = vadd.f32 %v2725_v34, %v2719_v37  ;;  %v5107_v34 = vld [vmem:[%s6218_s30 + $0x1d0] ss:$8 sps:$4 sm:$0xff]   ;;  %v5112_v35 = vld [vmem:[%s6218_s30 + $0xe4] ss:$8 sps:$4 sm:$0xff]   ;;  %v5110_v37 = vld [vmem:[%s6218_s30 + $0xe0] ss:$8 sps:$4 sm:$0xff]  }
 0x875   : > { %v5115_v36 = vld [vmem:[%s6218_s30 + $0x1e4] ss:$8 sps:$4 sm:$0xff]  }
 0x876   : > { %v2735_v40 = vpack.c.bf16 %v6497_v38, %v6497_v38  ;;  %v2734_v41 = vpack.c.bf16 %v6499_v39, %v6499_v39 }
 0x878   : > { %3174 = vmatprep.mubr.bf16.mxu0 %v2735_v40  ;;  %3215 = vmatprep.mubr.bf16.mxu1 %v2735_v40  ;;  %v5113_v40 = vld [vmem:[%s6218_s30 + $0x1e0] ss:$8 sps:$4 sm:$0xff]  }
 0x879   : > { %3175 = vmatmul.mubr.bf16.vlgmr.msra.gmra.mrb[24].mxu0 %v2734_v41  ;;  %3216 = vmatmul.mubr.bf16.vlgmr.msra.gmra.mrb[24].mxu1 %v2734_v41  ;;  %v5118_v41 = vld [vmem:[%s6218_s30 + $0xf4] ss:$8 sps:$4 sm:$0xff]  }
 0x87a   : > { %3629 = vmatpush1.bf16.msra.mxu0 %v5026_v42  ;;  %3670 = vmatpush1.bf16.msra.mxu1 %v5029_v43  ;;  %v5121_v42 = vld [vmem:[%s6218_s30 + $0x1f4] ss:$8 sps:$4 sm:$0xff]   ;;  %v5116_v43 = vld [vmem:[%s6218_s30 + $0xf0] ss:$8 sps:$4 sm:$0xff]  }
 0x87b   : > { %3630 = vmatprep.subr.bf16.mxu0 %v5034_v44  ;;  %3671 = vmatprep.subr.bf16.mxu1 %v5037_v45  ;;  %v5119_v44 = vld [vmem:[%s6218_s30 + $0x1f0] ss:$8 sps:$4 sm:$0xff]   ;;  %v2812_v45 = vsub.s32 2, %v6384_v53 }
 0x87e   : > { %3631 = vmatpush1.bf16.msra.mxu0 %v5032_v46  ;;  %3672 = vmatpush1.bf16.msra.mxu1 %v5035_v47  ;;  %v2800_v46 = vld [vmem:[%s6204_s4] sm:$0xf]  ;;  %v2816_v47 = vsub.s32 3, %v6384_v53 }
 0x87f   : > { %3632 = vmatprep.subr.bf16.mxu0 %v5040_v48  ;;  %3673 = vmatprep.subr.bf16.mxu1 %v5043_v49  ;;  %v2805_v48 = vrot.slane %v2800_v46, %v6387_v54  ;;  %v2813_v49 = vrot.slane %v2800_v46, %v2812_v45 }
 0x882   : > { %3633 = vmatpush1.bf16.msra.mxu0 %v5038_v50  ;;  %3674 = vmatpush1.bf16.msra.mxu1 %v5041_v51  ;;  %v2809_v50 = vrot.slane %v2800_v46, %v6395_v58  ;;  %v2817_v51 = vrot.slane %v2800_v46, %v2816_v47 }
 0x883   : > { %3634 = vmatprep.subr.bf16.mxu0 %v5046_v52  ;;  %3675 = vmatprep.subr.bf16.mxu1 %v5049_v56 }
 0x886   : > { %3635 = vmatpush1.bf16.msra.mxu0 %v5044_v57  ;;  %3676 = vmatpush1.bf16.msra.mxu1 %v5047_v59 }
 0x887   : > { %3636 = vmatprep.subr.bf16.mxu0 %v5052_v60  ;;  %3677 = vmatprep.subr.bf16.mxu1 %v5055_v61 }
 0x88a   : > { %3637 = vmatpush1.bf16.msra.mxu0 %v5050_v62  ;;  %3678 = vmatpush1.bf16.msra.mxu1 %v5053_v63 }
 0x88b   : > { %3638 = vmatprep.subr.bf16.mxu0 %v5058_v0  ;;  %3679 = vmatprep.subr.bf16.mxu1 %v5061_v55 }
 0x88e   : > { %3639 = vmatpush1.bf16.msra.mxu0 %v5056_v1  ;;  %3680 = vmatpush1.bf16.msra.mxu1 %v5059_v2 }
 0x88f   : > { %3640 = vmatprep.subr.bf16.mxu0 %v5064_v3  ;;  %3681 = vmatprep.subr.bf16.mxu1 %v5067_v4 }
 0x892   : > { %3641 = vmatpush1.bf16.msra.mxu0 %v5062_v5  ;;  %3682 = vmatpush1.bf16.msra.mxu1 %v5065_v6 }
 0x893   : > { %3642 = vmatprep.subr.bf16.mxu0 %v5070_v7  ;;  %3683 = vmatprep.subr.bf16.mxu1 %v5073_v8 }
 0x896   : > { %3643 = vmatpush1.bf16.msra.mxu0 %v5068_v9  ;;  %3684 = vmatpush1.bf16.msra.mxu1 %v5071_v10  ;;  %v3296_v10 = vld [vmem:[%s1047_s15] sm:$0x3] }
 0x897   : > { %3644 = vmatprep.subr.bf16.mxu0 %v5076_v11  ;;  %3685 = vmatprep.subr.bf16.mxu1 %v5079_v12  ;;  %v3301_v11 = vrot.slane %v3296_v10, %v6387_v54  ;;  %v3305_v12 = vrot.slane %v3296_v10, %v6395_v58 }
 0x89a   : > { %3645 = vmatpush1.bf16.msra.mxu0 %v5074_v13  ;;  %3686 = vmatpush1.bf16.msra.mxu1 %v5077_v14 }
 0x89b   : > { %3646 = vmatprep.subr.bf16.mxu0 %v5082_v15  ;;  %3687 = vmatprep.subr.bf16.mxu1 %v5085_v16 }
 0x89e   : > { %3647 = vmatpush1.bf16.msra.mxu0 %v5080_v17  ;;  %3688 = vmatpush1.bf16.msra.mxu1 %v5083_v18 }
 0x89f   : > { %3648 = vmatprep.subr.bf16.mxu0 %v5088_v19  ;;  %3689 = vmatprep.subr.bf16.mxu1 %v5091_v20 }
 0x8a2   : > { %3649 = vmatpush1.bf16.msra.mxu0 %v5086_v21  ;;  %3690 = vmatpush1.bf16.msra.mxu1 %v5089_v22 }
 0x8a3   : > { %3650 = vmatprep.subr.bf16.mxu0 %v5094_v23  ;;  %3691 = vmatprep.subr.bf16.mxu1 %v5097_v24 }
 0x8a6   : > { %3651 = vmatpush1.bf16.msra.mxu0 %v5092_v25  ;;  %3692 = vmatpush1.bf16.msra.mxu1 %v5095_v26 }
 0x8a7   : > { %3652 = vmatprep.subr.bf16.mxu0 %v5100_v27  ;;  %3693 = vmatprep.subr.bf16.mxu1 %v5103_v28 }
 0x8aa   : > { %3653 = vmatpush1.bf16.msra.mxu0 %v5098_v29  ;;  %3694 = vmatpush1.bf16.msra.mxu1 %v5101_v30 }
 0x8ab   : > { %3654 = vmatprep.subr.bf16.mxu0 %v5106_v31  ;;  %3695 = vmatprep.subr.bf16.mxu1 %v5109_v32 }
 0x8ae   : > { %3655 = vmatpush1.bf16.msra.mxu0 %v5104_v33  ;;  %3696 = vmatpush1.bf16.msra.mxu1 %v5107_v34 }
 0x8af   : > { %3656 = vmatprep.subr.bf16.mxu0 %v5112_v35  ;;  %3697 = vmatprep.subr.bf16.mxu1 %v5115_v36 }
 0x8b2   : > { %3657 = vmatpush1.bf16.msra.mxu0 %v5110_v37  ;;  %3698 = vmatpush1.bf16.msra.mxu1 %v5113_v40 }
 0x8b3   : > { %3658 = vmatprep.subr.bf16.mxu0 %v5118_v41  ;;  %3699 = vmatprep.subr.bf16.mxu1 %v5121_v42 }
 0x8b6   : > { %3659 = vmatpush1.bf16.msra.mxu0 %v5116_v43  ;;  %3700 = vmatpush1.bf16.msra.mxu1 %v5119_v44 }
 0x94c   : > { %v3176_v52 = vpop.f32.mrb[24].mxu0  ;;  %v3217_v56 = vpop.f32.mrb[24].mxu1 }
 0x94d   : > { %v3177_v57 = vadd.f32 %v3176_v52, %v2805_v48  ;;  %v3218_v59 = vadd.f32 %v3217_v56, %v2813_v49  ;;  %v3178_v60 = vpop.f32.mrb[25].mxu0  ;;  %v3219_v61 = vpop.f32.mrb[25].mxu1 }
 0x94e   : > { %v3179_v62 = vadd.f32 %v3178_v60, %v2809_v50  ;;  %v3220_v63 = vadd.f32 %v3219_v61, %v2817_v51  ;;  %v3180_v0 = vpop.f32.mrb[26].mxu0  ;;  %v3221_v55 = vpop.f32.mrb[26].mxu1 }
 0x94f   : > { %v3224_v1 = vmax.f32 %v3177_v57, 0.0  ;;  %v3226_v2 = vmax.f32 %v3218_v59, 0.0  ;;  %v3181_v53 = vpop.f32.mrb[27].mxu0  ;;  %v3222_v3 = vpop.f32.mrb[27].mxu1 }
 0x950   : > { %v3225_v4 = vmax.f32 %v3179_v62, 0.0  ;;  %v3227_v5 = vmax.f32 %v3220_v63, 0.0 }
 0x951   : > { %v3228_v8 = vpack.c.bf16 %v3224_v1, %v3224_v1  ;;  %v3230_v9 = vpack.c.bf16 %v3226_v2, %v3226_v2 }
 0x952   : > { %v3229_v6 = vpack.c.bf16 %v3225_v4, %v3225_v4  ;;  %v3231_v7 = vpack.c.bf16 %v3227_v5, %v3227_v5 }
 0x954   : > { %3660 = vmatprep.mubr.bf16.mxu0 %v3229_v6  ;;  %3701 = vmatprep.mubr.bf16.mxu1 %v3231_v7 }
 0x955   : > { %3661 = vmatmul.mubr.bf16.vlgmr.msra.gmra.mrb[28].mxu0 %v3228_v8  ;;  %3702 = vmatmul.mubr.bf16.vlgmr.msra.gmra.mrb[28].mxu1 %v3230_v9 }
 0xa28   : > { %v3662_v13 = vpop.f32.mrb[28].mxu0  ;;  %v3703_v14 = vpop.f32.mrb[28].mxu1 }
 0xa29   : > { %v3663_v15 = vadd.f32 %v3662_v13, %v3301_v11  ;;  %v3664_v16 = vpop.f32.mrb[29].mxu0  ;;  %v3705_v17 = vpop.f32.mrb[29].mxu1 }
 0xa2a   : > { %v3665_v18 = vadd.f32 %v3664_v16, %v3305_v12  ;;  %v3666_v19 = vpop.f32.mrb[30].mxu0  ;;  %v3707_v20 = vpop.f32.mrb[30].mxu1 }
 0xa2b   : > { %v3704_v21 = vadd.f32 %v3703_v14, %v3663_v15  ;;  %v3667_v22 = vpop.f32.mrb[31].mxu0  ;;  %v3708_v23 = vpop.f32.mrb[31].mxu1 }
 0xa2c   : > { %v3706_v24 = vadd.f32 %v3705_v17, %v3665_v18 }
 0xa2d   : > { %v3710_v25 = vadd.f32 %v3704_v21, %v6499_v39  ;;  %v3713_v39 = vld [vmem:[%s1055_s6] sm:$0x3] }
 0xa2e   : > { %v3711_v26 = vadd.f32 %v3706_v24, %v6497_v38  ;;  %v3712_v38 = vld [vmem:[%s1051_s7] sm:$0x3]  ;;  %v3747_v43 = vrot.slane %v3713_v39, %v6387_v54  ;;  %v3751_v44 = vrot.slane %v3713_v39, %v6395_v58 }
 0xa2f   : > { %v3734_v40 = vrot.slane %v3712_v38, %v6387_v54  ;;  %v3738_v41 = vrot.slane %v3712_v38, %v6395_v58 }
 0xa30   : > { %v3714_v27 = vadd.f32 %v3711_v26, %v3710_v25 }
 0xa32   : > { %3715 = vadd.xlane.f32.xlu0 %v3714_v27 }
 0xabf   : > { %v3716_v28 = vpop.xlane.xlu0 %3715 }
 0xac0   : > { %v3717_v29 = vmul.f32 0.00390625, %v3716_v28 }
 0xac2   : > { %v3718_v30 = vsub.f32 %v3710_v25, %v3717_v29  ;;  %v3719_v31 = vsub.f32 %v3711_v26, %v3717_v29 }
 0xac4   : > { %v3720_v32 = vmul.f32 %v3718_v30, %v3718_v30  ;;  %v3721_v33 = vmul.f32 %v3719_v31, %v3719_v31 }
 0xac6   : > { %v3722_v34 = vadd.f32 %v3721_v33, %v3720_v32 }
 0xac8   : > { %3723 = vadd.xlane.f32.xlu1 %v3722_v34 }
 0xb55   : > { %v3724_v35 = vpop.xlane.xlu1 %3723 }
 0xb56   : > { %v3725_v36 = vmul.f32 0.00390625, %v3724_v35 }
 0xb58   : > { %v3726_v37 = vadd.f32 1e-05, %v3725_v36 }
 0xb5a   : > { %5132 = vrsqrt.f32 %v3726_v37 }
 0xb64   : > { %v5133_v42 = vpop.eup %5132 }
 0xb65   : > { %v3728_v45 = vmul.f32 %v5133_v42, %v3718_v30  ;;  %v3729_v46 = vmul.f32 %v5133_v42, %v3719_v31  ;;  %3761 = sbr.rel (%p4444_p1) target bundleno = 2925 (0xb6d), region = 140 }
 0xb67   : > { %v3741_v47 = vmul.f32 %v3734_v40, %v3728_v45  ;;  %v3742_v48 = vmul.f32 %v3738_v41, %v3729_v46 }
 0xb69   : > { %v3754_v49 = vadd.f32 %v3747_v43, %v3741_v47  ;;  %v3755_v50 = vadd.f32 %v3751_v44, %v3742_v48 }
 0xb6b   : > { %3756 = vst [vmem:[#allocation2] sm:$0xff] %v3754_v49  ;;  %3757 = vst [vmem:[#allocation2 + $0x8] sm:$0xff] %v3755_v50 }
 0xb6c   : > { %3762 = vst [vmem:[%s6220_s10] sm:$0xff] %v3754_v49  ;;  %3763 = vst [vmem:[%s6220_s10 + $0x8] sm:$0xff] %v3755_v50 }
 0xb6d PF: > { %s6864_s18 = sld [smem:[#allocation31_spill]]  ;;  %s6865_s7 = sld [smem:[#allocation47_spill]] }
 0xb6e   : > { %s6866_s3 = sld [smem:[#allocation42_spill]]  ;;  %s6867_s22 = sld [smem:[#allocation71_spill]] }
 0xb6f   : > { %s3779_s23 = sshll.u32 %s6220_s10, 4  ;;  %s5561_s25 = smov [#allocation18]   ;;  %s3780_s23 = int_to_ptr.vmem [resolvable:$true] %s3779_s23 }
 0xb70   : > { %s5402_s11 = scalar_lea.vmem %s3780_s23, 256  ;;  %s5406_s29 = sshll.u32 %s5561_s25, 4  ;;  %s5407_s29 = int_to_ptr.vmem [resolvable:$false] %s5406_s29 }
 0xb71   : > { %p5403_p7 = scmp.ne.s32.totalorder %s3780_s23, %s5402_s11  ;;  %s5408_s13 = scalar_lea.vmem %s5407_s29, 512 }
 0xb72   : > { %p5409_p9 = scmp.lt.s32.totalorder %s3780_s23, %s5407_s29  ;;  %p5410_p6 = scmp.lt.s32.totalorder %s5408_s13, %s5402_s11 }
 0xb73   : > { %s4456_s17 = sshll.u32 %s6864_s18, 8  ;;  %s3765_s26 = scalar_lea.sflag [#allocation5], %s6865_s7 }
 0xb74   : > { %s6868_s12 = smov %s6867_s22  ;;  %s6602_s16 = scalar_lea.hbm %s6867_s22, %s4456_s17 }
 0xb75   : > { %p6869_p2 = scmp.ne.s32.totalorder %s6866_s3, 0  ;;  %p5411_p8 = por %p5410_p6, %p5409_p9 }
 0xb77   : > { %p5404_p3 = pnand %p5403_p7, %p6869_p2 }
 0xb79   : > { %p5405_p10 = pneg %p5404_p3 }
 0xb7b   : > { %p5412_p5 = pnand %p5411_p8, %p5405_p10 }
 0xb7d   : > { %5415 = shalt.err (!%p5412_p5)
}
 0xb7e   : > { %s5416_s10 = scalar_lea.hbm %s6602_s16, 256  ;;  %s5420_s2 = scalar_lea.hbm %s6868_s12, 512 }
 0xb7f   : > { %p5417_p13 = scmp.ne.s32.totalorder %s6602_s16, %s5416_s10  ;;  %p5421_p11 = scmp.lt.u32.totalorder %s6602_s16, %s6868_s12 }
 0xb80   : > { %p5422_p0 = scmp.lt.u32.totalorder %s5420_s2, %s5416_s10  ;;  %p5424_p7 = scmp.lt.u32.totalorder %s5416_s10, %s6602_s16 }
 0xb81   : > { %p5418_p12 = pnand %p5417_p13, %p6869_p2 }
 0xb82   : > { %p5423_p1 = por %p5422_p0, %p5421_p11 }
 0xb83   : > { %p5419_p4 = pneg %p5418_p12 }
 0xb84   : > { %p5425_p3 = por %p5424_p7, %p5423_p1 }
 0xb86   : > { %p5426_p10 = pnand %p5425_p3, %p5419_p4 }
 0xb88   : > { %5429 = shalt.err (!%p5426_p10)
}
 0xb89   : > { %4643 = dma.vmem_to_hbm [thread:$0]  (%p6869_p2), %s3780_s23, 256, %s6602_s16, %s3765_s26  }
 0xb8a PF: > { %s6870_s4 = sld [smem:[#allocation34_spill]]  ;;  %s6871_s0 = sld [smem:[#allocation27_spill]] }
 0xb8b   : > { %s6872_s30 = sld [smem:[#allocation45_spill]] }
 0xb90   : > { %p4683_p9 = scmp.ge.s32.totalorder %s6870_s4, 2  ;;  %s3791_s15 = sand.u32 1, %s6871_s0  }
 0xb91   : > { %p6873_p6 = scmp.ne.s32.totalorder %s6872_s30, 0  ;;  %s3792_s8 = scalar_lea.sflag [#allocation5], %s3791_s15 }
 0xb93   : > { %p4675_p8 = pnand %p4683_p9, %p6873_p6 }
 0xb95   : > { %5495 = dma.done.wait (!%p4675_p8), %s3792_s8, 256  }
 0xb96   : > { %5497 = vsyncadd (!%p4675_p8), %s3792_s8, 4294967040  ;;  %s45_s3 = sadd.s32 1, %s6870_s4   ;;  %s6874_s0 = sld [smem:[#allocation25_spill]] }
 0xb97   : > { %p42_p5 = scmp.ge.s32.totalorder %s45_s3, 6   ;;  %s6875_s30 = sld [smem:[#allocation26_spill]] }
 0xb98   : > { %s6876_s20 = sld [smem:[#allocation44_spill]]  ;;  %s6877_s21 = sld [smem:[#allocation28_spill]] }
 0xb99   : > { %s6878_s1 = sld [smem:[#allocation29_spill]]  ;;  %s6879_s22 = sld [smem:[#allocation46_spill]] }
 0xb9a   : > { %s6880_s2 = sld [smem:[#allocation32_spill]]  ;;  %s6881_s23 = sld [smem:[#allocation33_spill]] }
 0xb9b   : > { %s6882_s24 = sld [smem:[#allocation41_spill]]  ;;  %s6883_s25 = sld [smem:[#allocation43_spill]] }
 0xb9c   :  { %44 = sbr.rel (!%p42_p5) target bundleno = 37 (0x25), region = 259 }
 0xba3   :  { %3797 = vsyncpa [#allocation4], 1 }
 0xba4   :  { %3799 = vsyncpa [#allocation4 + $0x1], 1 }
 0xba5   :  { %3800 = vsyncpa [#allocation7], 1 }
 0xba6   :  { %3801 = vsyncpa [#allocation10], 1 }
 0xba7   :  { %3803 = vsyncpa [#allocation10 + $0x1], 1 }
 0xba8   :  { %3804 = vsyncpa [#allocation13], 1 }
 0xba9   :  { %3806 = vsyncpa [#allocation13 + $0x1], 1 }
 0xbaa   :  { %3807 = vsyncpa [#allocation16], 1 }
 0xbab   :  { %3809 = vsyncpa [#allocation16 + $0x1], 1 }
 0xbac   :  { %3810 = vsyncpa [#allocation5], 1 }
 0xbad   :  { %3812 = vsyncpa [#allocation5 + $0x1], 1 }

</bundles_post_ra>
